<compile_context>
chip_gen: v6e
topology: v6e:2x2x1
jax: 0.10.0
libtpu: 0.0.40
codegen_flags: <defaults>
</compile_context>

<pallas_src>
import jax
import jax.numpy as jnp
from jax.experimental import pallas as pl
from jax.experimental.pallas import tpu as pltpu

LANES = 128        # lane-dense output width (all Cout / FC widths padded to this)
MAX_TILE_M = 2048  # rows per grid step cap; ~7 MB/step for stage 2 (fits v7x/v5e limits)


def _round_up(x, m):
    return (x + m - 1) // m * m


def _tile_rows(mp, max_tile=MAX_TILE_M):
    """Pick (tile_m, mp_pad): tiles are multiples of 16 and (when there is enough
    work) the grid has >= 2 steps so v7x's second TensorCore gets a share."""
    mp16 = _round_up(max(mp, 1), 16)
    half = _round_up(pl.cdiv(mp16, 2), 16)
    tile = min(max_tile, max(16, half))
    mp_pad = _round_up(mp16, tile)
    return tile, mp_pad


# ----------------------------------------------------------------------------
# Pallas kernels
# ----------------------------------------------------------------------------
def _conv_tanh_pool_kernel(p_ref, w_ref, b_ref, o_ref):
    """Fused conv (patch matmul) + bias + tanh + 2x2 average pool.

    p_ref: (4, TM, K) bf16 -- im2col patch rows for the 4 pool taps.
    w_ref: (K, 128) bf16   -- conv weights, Cout zero-padded to 128 lanes.
    b_ref: (1, 128) f32    -- bias, zero-padded.
    o_ref: (TM, 128) bf16  -- pooled activation, rows ordered (b, ph, pw).
    """
    n_tap, tm, k = p_ref.shape
    # One long LHS stream through the MXU instead of 4 short matmuls.
    t = jnp.dot(p_ref[...].reshape(n_tap * tm, k), w_ref[...],
                preferred_element_type=jnp.float32) + b_ref[...]
    t = jnp.tanh(t)                                   # f32 EUP (portable on v5e)
    pooled = jnp.sum(t.reshape(n_tap, tm, LANES), axis=0) * 0.25
    o_ref[...] = pooled.astype(o_ref.dtype)


def _head_kernel(x_ref, w3_ref, b3_ref, w4_ref, b4_ref, w5_ref, b5_ref, o_ref):
    """conv3 (1x1 spatial output) + tanh + fc1 + tanh + fc2, resident in VMEM."""
    h = jnp.tanh(
        jnp.dot(x_ref[...], w3_ref[...], preferred_element_type=jnp.float32)
        + b3_ref[...])
    h = jnp.tanh(
        jnp.dot(h.astype(jnp.bfloat16), w4_ref[...],
                preferred_element_type=jnp.float32) + b4_ref[...])
    o_ref[...] = (
        jnp.dot(h.astype(jnp.bfloat16), w5_ref[...],
                preferred_element_type=jnp.float32) + b5_ref[...])


# ----------------------------------------------------------------------------
# One-time weight packing (hoisted out of the per-forward path)
# ----------------------------------------------------------------------------
def _pack_matrix(wmat, bias, k_pad=None):
    """(K, N) weight + (N,) bias -> ((k_pad or K), 128) bf16, (1, 128) f32."""
    K, N = wmat.shape
    kp = K if k_pad is None else k_pad
    w = jnp.zeros((kp, LANES), jnp.float32).at[:K, :N].set(wmat)
    b = jnp.zeros((1, LANES), jnp.float32).at[0, :N].set(bias)
    return w.astype(jnp.bfloat16), b


def pack_params(params):
    """Run ONCE (eagerly).  Pads Cout/FC widths to 128 lanes, casts to bf16 and
    pre-permutes conv3 rows to the NHWC-natural (kh, kw, ci) order."""
    w1, b1 = _pack_matrix(params["conv1_w"].reshape(6, 25).T, params["conv1_b"])
    w2, b2 = _pack_matrix(params["conv2_w"].reshape(16, 150).T, params["conv2_b"])
    w3m = params["conv3_w"].transpose(0, 2, 3, 1).reshape(120, 400).T  # (kh,kw,ci)
    w3, b3 = _pack_matrix(w3m, params["conv3_b"])
    w4, b4 = _pack_matrix(params["fc1_w"].T, params["fc1_b"], k_pad=LANES)
    w5, b5 = _pack_matrix(params["fc2_w"].T, params["fc2_b"], k_pad=LANES)
    return {"conv1": (w1, b1), "conv2": (w2, b2),
            "head": (w3, b3, w4, b4, w5, b5)}


# ----------------------------------------------------------------------------
# Stage wrappers
# ----------------------------------------------------------------------------
def _conv_tanh_pool(a, wm, bm, cout, pad):
    """a: (B, H, W, Cin) NHWC; wm/bm packed.  Returns (B, PH, PW, cout) bf16."""
    a = a.astype(jnp.bfloat16)                        # bf16 BEFORE the 25x im2col
    B, H, W, Cin = a.shape
    k = 5
    OH = H + 2 * pad - (k - 1)
    OW = W + 2 * pad - (k - 1)
    PH, PW = OH // 2, OW // 2
    K = Cin * k * k

    if pad:
        a = jnp.pad(a, ((0, 0), (pad, pad), (pad, pad), (0, 0)))
    # TODO(synk): building the im2col patches inside the kernel from the raw
    # padded NHWC tile would cut stage-input HBM traffic ~25x; kept as XLA glue.
    # Feature order (ci, kh, kw) matches PyTorch's weight.reshape(Cout, Cin*25).
    cols = [a[:, kh:kh + OH, kw:kw + OW, :]
            for kh in range(k) for kw in range(k)]
    p = jnp.stack(cols, axis=-1)                      # (B, OH, OW, Cin, 25) bf16
    p = p.reshape(B, OH, OW, K)
    # Rows ordered (pool_tap, b, ph, pw): pooling = sum of 4 contiguous blocks.
    p = p.reshape(B, PH, 2, PW, 2, K).transpose(2, 4, 0, 1, 3, 5)
    p = p.reshape(4, B * PH * PW, K)

    Mp = B * PH * PW
    tile_m, mp_pad = _tile_rows(Mp)
    if mp_pad != Mp:
        p = jnp.pad(p, ((0, 0), (0, mp_pad - Mp), (0, 0)))

    out = pl.pallas_call(
        _conv_tanh_pool_kernel,
        out_shape=jax.ShapeDtypeStruct((mp_pad, LANES), jnp.bfloat16),
        grid=(mp_pad // tile_m,),
        in_specs=[
            pl.BlockSpec((4, tile_m, K), lambda i: (0, i, 0)),
            pl.BlockSpec((K, LANES), lambda i: (0, 0)),
            pl.BlockSpec((1, LANES), lambda i: (0, 0)),
        ],
        out_specs=pl.BlockSpec((tile_m, LANES), lambda i: (i, 0)),
        compiler_params=pltpu.CompilerParams(
            dimension_semantics=("parallel",)),
        cost_estimate=pl.CostEstimate(
            flops=2 * 4 * mp_pad * K * LANES,
            transcendentals=4 * mp_pad * LANES,
            bytes_accessed=4 * mp_pad * K * 2 + K * LANES * 2
                           + mp_pad * LANES * 2),
    )(p, wm, bm)

    return out[:Mp].reshape(B, PH, PW, LANES)[..., :cout]


def _head(a, head_params):
    """a: (B, 5, 5, 16) bf16 NHWC -> logits (B, 10) f32."""
    w3, b3, w4, b4, w5, b5 = head_params
    B = a.shape[0]
    x = a.reshape(B, 400)                             # (kh, kw, ci) -- matches w3
    tile_m, mp_pad = _tile_rows(B)
    x = jnp.pad(x, ((0, mp_pad - B), (0, 0)))

    def const(shape):
        return pl.BlockSpec(shape, lambda i: (0,) * len(shape))

    out = pl.pallas_call(
        _head_kernel,
        out_shape=jax.ShapeDtypeStruct((mp_pad, LANES), jnp.float32),
        grid=(mp_pad // tile_m,),
        in_specs=[pl.BlockSpec((tile_m, 400), lambda i: (i, 0)),
                  const((400, LANES)), const((1, LANES)),
                  const((LANES, LANES)), const((1, LANES)),
                  const((LANES, LANES)), const((1, LANES))],
        out_specs=pl.BlockSpec((tile_m, LANES), lambda i: (i, 0)),
        compiler_params=pltpu.CompilerParams(
            dimension_semantics=("parallel",)),
        cost_estimate=pl.CostEstimate(
            flops=2 * mp_pad * LANES * (400 + LANES + LANES),
            transcendentals=2 * mp_pad * LANES,
            bytes_accessed=mp_pad * 400 * 2 + (400 + 2 * LANES) * LANES * 2
                           + mp_pad * LANES * 4),
    )(x, w3, b3, w4, b4, w5, b5)
    return out[:B, :10]


# ----------------------------------------------------------------------------
# LeNet5 forward (matches the PyTorch module); takes pre-packed weights
# ----------------------------------------------------------------------------
def lenet5_forward(packed, x):
    """x: (B, 1, 28, 28) NCHW like the PyTorch module; returns (B, 10) f32 logits."""
    a = jnp.transpose(x, (0, 2, 3, 1))                                     # NHWC
    a = _conv_tanh_pool(a, *packed["conv1"], cout=6, pad=2)   # (B,14,14,6) bf16
    a = _conv_tanh_pool(a, *packed["conv2"], cout=16, pad=0)  # (B,5,5,16)  bf16
    # TODO(synk): stage 2 + head could be one pallas_call (keep the pooled tile
    # in VMEM and regather (b,ph,pw,c)->(b,400) in-kernel); left as XLA glue.
    return _head(a, packed["head"])


# ----------------------------------------------------------------------------
# Pure-JAX reference (numerical sanity check)
# ----------------------------------------------------------------------------
def lenet5_reference(params, x):
    def conv(x, w, b, pad):
        y = jax.lax.conv_general_dilated(
            x, w, window_strides=(1, 1), padding=[(pad, pad), (pad, pad)],
            dimension_numbers=("NCHW", "OIHW", "NCHW"))
        return y + b[None, :, None, None]

    def pool(x):
        B, C, H, W = x.shape
        return x.reshape(B, C, H // 2, 2, W // 2, 2).mean(axis=(3, 5))

    x = jnp.tanh(conv(x, params["conv1_w"], params["conv1_b"], 2))
    x = pool(x)
    x = jnp.tanh(conv(x, params["conv2_w"], params["conv2_b"], 0))
    x = pool(x)
    x = jnp.tanh(conv(x, params["conv3_w"], params["conv3_b"], 0))
    x = x.reshape(-1, 120)
    x = jnp.tanh(x @ params["fc1_w"].T + params["fc1_b"])
    x = x @ params["fc2_w"].T + params["fc2_b"]
    return x


# ----------------------------------------------------------------------------
# Deterministic parameter init (PyTorch-default-style uniform(+-1/sqrt(fan_in)))
# ----------------------------------------------------------------------------
def init_params(key):
    def uni(key, shape, fan_in):
        bound = 1.0 / jnp.sqrt(jnp.float32(fan_in))
        return jax.random.uniform(key, shape, jnp.float32, -bound, bound)

    ks = jax.random.split(key, 10)
    return {
        "conv1_w": uni(ks[0], (6, 1, 5, 5), 25),
        "conv1_b": uni(ks[1], (6,), 25),
        "conv2_w": uni(ks[2], (16, 6, 5, 5), 150),
        "conv2_b": uni(ks[3], (16,), 150),
        "conv3_w": uni(ks[4], (120, 16, 5, 5), 400),
        "conv3_b": uni(ks[5], (120,), 400),
        "fc1_w": uni(ks[6], (84, 120), 120),
        "fc1_b": uni(ks[7], (84,), 120),
        "fc2_w": uni(ks[8], (10, 84), 84),
        "fc2_b": uni(ks[9], (10,), 84),
    }


if __name__ == "__main__":
    key = jax.random.PRNGKey(0)
    pkey, xkey = jax.random.split(key)
    params = init_params(pkey)
    packed = pack_params(params)          # one-time weight packing (not per-forward)

    # conv3 (5x5, no pad) collapsing to 1x1x120 implies 28x28 single-channel input
    # (conv1 pad=2 keeps 28 -> pool 14 -> conv2 10 -> pool 5 -> conv3 1x1).
    x = jax.random.normal(xkey, (2, 1, 28, 28), dtype=jnp.float32)

    out = jax.block_until_ready(jax.jit(lenet5_forward)(packed, x))
    assert out.shape == (2, 10) and out.dtype == jnp.float32

    ref = jax.block_until_ready(jax.jit(lenet5_reference)(params, x))
    max_err = float(jnp.max(jnp.abs(out - ref)))
    # bf16 MXU operands / bf16 inter-stage activations with f32 accumulation.
    assert max_err < 5e-2, f"mismatch vs reference: {max_err}"

    print("KERNEL_OK")
</pallas_src>

<mosaic_0001>
module attributes {stable_mosaic.version = 11 : i64} {
  func.func @_conv_tanh_pool_kernel(%arg0: i32, %arg1: memref<4x208x25xbf16, #tpu.memory_space<vmem>>, %arg2: memref<25x128xbf16, #tpu.memory_space<vmem>>, %arg3: memref<1x128xf32, #tpu.memory_space<vmem>>, %arg4: memref<208x128xbf16, #tpu.memory_space<vmem>>) attributes {dimension_semantics = [#tpu.dimension_semantics<parallel>], iteration_bounds = array<i64: 2>, scalar_prefetch = 0 : i64, scratch_operands = 0 : i64, tpu.core_type = #tpu.core_type<tc>, window_params = [{transform_indices = @transform_0, window_bounds = array<i64: 4, 208, 25>}, {pipeline_mode = #tpu.pipeline_mode<synchronous>, transform_indices = @transform_1, window_bounds = array<i64: 25, 128>}, {pipeline_mode = #tpu.pipeline_mode<synchronous>, transform_indices = @transform_2, window_bounds = array<i64: 1, 128>}, {transform_indices = @transform_3, window_bounds = array<i64: 208, 128>}]} {
    %c0 = arith.constant 0 : index
    %c0_0 = arith.constant 0 : index
    %c0_1 = arith.constant 0 : index
    %0 = vector.load %arg1[%c0, %c0_0, %c0_1] : memref<4x208x25xbf16, #tpu.memory_space<vmem>>, vector<4x208x25xbf16>
    %1 = vector.shape_cast %0 : vector<4x208x25xbf16> to vector<832x25xbf16>
    %c0_2 = arith.constant 0 : index
    %c0_3 = arith.constant 0 : index
    %2 = vector.load %arg2[%c0_2, %c0_3] : memref<25x128xbf16, #tpu.memory_space<vmem>>, vector<25x128xbf16>
    %cst = arith.constant dense<0.000000e+00> : vector<832x128xf32>
    %3 = tpu.matmul %1, %2, %cst {dimension_numbers = #tpu.dot_dimension_numbers<[1], [0], [0], [1], [0, 0, 1, 1], [], []>} : vector<832x25xbf16>, vector<25x128xbf16>, vector<832x128xf32> -> vector<832x128xf32>
    %c0_4 = arith.constant 0 : index
    %c0_5 = arith.constant 0 : index
    %4 = vector.load %arg3[%c0_4, %c0_5] : memref<1x128xf32, #tpu.memory_space<vmem>>, vector<1x128xf32>
    %5 = vector.broadcast %4 : vector<1x128xf32> to vector<832x128xf32>
    %6 = arith.addf %3, %5 : vector<832x128xf32>
    %7 = math.tanh %6 : vector<832x128xf32>
    %8 = vector.shape_cast %7 : vector<832x128xf32> to vector<4x208x128xf32>
    %cst_6 = arith.constant dense<0.000000e+00> : vector<208x128xf32>
    %9 = vector.multi_reduction <add>, %8, %cst_6 [0] : vector<4x208x128xf32> to vector<208x128xf32>
    %cst_7 = arith.constant 2.500000e-01 : f32
    %10 = vector.broadcast %cst_7 : f32 to vector<208x128xf32>
    %11 = arith.mulf %9, %10 : vector<208x128xf32>
    %12 = arith.truncf %11 : vector<208x128xf32> to vector<208x128xbf16>
    %c0_8 = arith.constant 0 : index
    %c0_9 = arith.constant 0 : index
    %13 = vector.load %arg4[%c0_8, %c0_9] : memref<208x128xbf16, #tpu.memory_space<vmem>>, vector<208x128xbf16>
    tpu.vector_store %arg4[%c0_8, %c0_9], %12 {strides = array<i32>} : memref<208x128xbf16, #tpu.memory_space<vmem>>, vector<208x128xbf16>,
    return
  }
  func.func @transform_0(%arg0: i32) -> (i32, i32, i32) {
    %c0_i32 = arith.constant 0 : i32
    %c0_i32_0 = arith.constant 0 : i32
    %c0_i32_1 = arith.constant 0 : i32
    return %c0_i32, %arg0, %c0_i32_0 : i32, i32, i32
  }
  func.func @transform_1(%arg0: i32) -> (i32, i32) {
    %c0_i32 = arith.constant 0 : i32
    %c0_i32_0 = arith.constant 0 : i32
    %c0_i32_1 = arith.constant 0 : i32
    return %c0_i32, %c0_i32_0 : i32, i32
  }
  func.func @transform_2(%arg0: i32) -> (i32, i32) {
    %c0_i32 = arith.constant 0 : i32
    %c0_i32_0 = arith.constant 0 : i32
    %c0_i32_1 = arith.constant 0 : i32
    return %c0_i32, %c0_i32_0 : i32, i32
  }
  func.func @transform_3(%arg0: i32) -> (i32, i32) {
    %c0_i32 = arith.constant 0 : i32
    %c0_i32_0 = arith.constant 0 : i32
    return %arg0, %c0_i32 : i32, i32
  }
}

module attributes {stable_mosaic.version = 11 : i64} {
  func.func @_conv_tanh_pool_kernel(%arg0: i32, %arg1: memref<4x32x150xbf16, #tpu.memory_space<vmem>>, %arg2: memref<150x128xbf16, #tpu.memory_space<vmem>>, %arg3: memref<1x128xf32, #tpu.memory_space<vmem>>, %arg4: memref<32x128xbf16, #tpu.memory_space<vmem>>) attributes {dimension_semantics = [#tpu.dimension_semantics<parallel>], iteration_bounds = array<i64: 2>, scalar_prefetch = 0 : i64, scratch_operands = 0 : i64, tpu.core_type = #tpu.core_type<tc>, window_params = [{transform_indices = @transform_0, window_bounds = array<i64: 4, 32, 150>}, {pipeline_mode = #tpu.pipeline_mode<synchronous>, transform_indices = @transform_1, window_bounds = array<i64: 150, 128>}, {pipeline_mode = #tpu.pipeline_mode<synchronous>, transform_indices = @transform_2, window_bounds = array<i64: 1, 128>}, {transform_indices = @transform_3, window_bounds = array<i64: 32, 128>}]} {
    %c0 = arith.constant 0 : index
    %c0_0 = arith.constant 0 : index
    %c0_1 = arith.constant 0 : index
    %0 = vector.load %arg1[%c0, %c0_0, %c0_1] : memref<4x32x150xbf16, #tpu.memory_space<vmem>>, vector<4x32x150xbf16>
    %1 = vector.shape_cast %0 : vector<4x32x150xbf16> to vector<128x150xbf16>
    %c0_2 = arith.constant 0 : index
    %c0_3 = arith.constant 0 : index
    %2 = vector.load %arg2[%c0_2, %c0_3] : memref<150x128xbf16, #tpu.memory_space<vmem>>, vector<150x128xbf16>
    %cst = arith.constant dense<0.000000e+00> : vector<128x128xf32>
    %3 = tpu.matmul %1, %2, %cst {dimension_numbers = #tpu.dot_dimension_numbers<[1], [0], [0], [1], [0, 0, 1, 1], [], []>} : vector<128x150xbf16>, vector<150x128xbf16>, vector<128x128xf32> -> vector<128x128xf32>
    %c0_4 = arith.constant 0 : index
    %c0_5 = arith.constant 0 : index
    %4 = vector.load %arg3[%c0_4, %c0_5] : memref<1x128xf32, #tpu.memory_space<vmem>>, vector<1x128xf32>
    %5 = vector.broadcast %4 : vector<1x128xf32> to vector<128x128xf32>
    %6 = arith.addf %3, %5 : vector<128x128xf32>
    %7 = math.tanh %6 : vector<128x128xf32>
    %8 = vector.shape_cast %7 : vector<128x128xf32> to vector<4x32x128xf32>
    %cst_6 = arith.constant dense<0.000000e+00> : vector<32x128xf32>
    %9 = vector.multi_reduction <add>, %8, %cst_6 [0] : vector<4x32x128xf32> to vector<32x128xf32>
    %cst_7 = arith.constant 2.500000e-01 : f32
    %10 = vector.broadcast %cst_7 : f32 to vector<32x128xf32>
    %11 = arith.mulf %9, %10 : vector<32x128xf32>
    %12 = arith.truncf %11 : vector<32x128xf32> to vector<32x128xbf16>
    %c0_8 = arith.constant 0 : index
    %c0_9 = arith.constant 0 : index
    %13 = vector.load %arg4[%c0_8, %c0_9] : memref<32x128xbf16, #tpu.memory_space<vmem>>, vector<32x128xbf16>
    tpu.vector_store %arg4[%c0_8, %c0_9], %12 {strides = array<i32>} : memref<32x128xbf16, #tpu.memory_space<vmem>>, vector<32x128xbf16>,
    return
  }
  func.func @transform_0(%arg0: i32) -> (i32, i32, i32) {
    %c0_i32 = arith.constant 0 : i32
    %c0_i32_0 = arith.constant 0 : i32
    %c0_i32_1 = arith.constant 0 : i32
    return %c0_i32, %arg0, %c0_i32_0 : i32, i32, i32
  }
  func.func @transform_1(%arg0: i32) -> (i32, i32) {
    %c0_i32 = arith.constant 0 : i32
    %c0_i32_0 = arith.constant 0 : i32
    %c0_i32_1 = arith.constant 0 : i32
    return %c0_i32, %c0_i32_0 : i32, i32
  }
  func.func @transform_2(%arg0: i32) -> (i32, i32) {
    %c0_i32 = arith.constant 0 : i32
    %c0_i32_0 = arith.constant 0 : i32
    %c0_i32_1 = arith.constant 0 : i32
    return %c0_i32, %c0_i32_0 : i32, i32
  }
  func.func @transform_3(%arg0: i32) -> (i32, i32) {
    %c0_i32 = arith.constant 0 : i32
    %c0_i32_0 = arith.constant 0 : i32
    return %arg0, %c0_i32 : i32, i32
  }
}

module attributes {stable_mosaic.version = 11 : i64} {
  func.func @_head_kernel(%arg0: i32, %arg1: memref<16x400xbf16, #tpu.memory_space<vmem>>, %arg2: memref<400x128xbf16, #tpu.memory_space<vmem>>, %arg3: memref<1x128xf32, #tpu.memory_space<vmem>>, %arg4: memref<128x128xbf16, #tpu.memory_space<vmem>>, %arg5: memref<1x128xf32, #tpu.memory_space<vmem>>, %arg6: memref<128x128xbf16, #tpu.memory_space<vmem>>, %arg7: memref<1x128xf32, #tpu.memory_space<vmem>>, %arg8: memref<16x128xf32, #tpu.memory_space<vmem>>) attributes {dimension_semantics = [#tpu.dimension_semantics<parallel>], iteration_bounds = array<i64: 1>, scalar_prefetch = 0 : i64, scratch_operands = 0 : i64, tpu.core_type = #tpu.core_type<tc>, window_params = [{transform_indices = @transform_0, window_bounds = array<i64: 16, 400>}, {pipeline_mode = #tpu.pipeline_mode<synchronous>, transform_indices = @transform_1, window_bounds = array<i64: 400, 128>}, {pipeline_mode = #tpu.pipeline_mode<synchronous>, transform_indices = @transform_2, window_bounds = array<i64: 1, 128>}, {pipeline_mode = #tpu.pipeline_mode<synchronous>, transform_indices = @transform_3, window_bounds = array<i64: 128, 128>}, {pipeline_mode = #tpu.pipeline_mode<synchronous>, transform_indices = @transform_4, window_bounds = array<i64: 1, 128>}, {pipeline_mode = #tpu.pipeline_mode<synchronous>, transform_indices = @transform_5, window_bounds = array<i64: 128, 128>}, {pipeline_mode = #tpu.pipeline_mode<synchronous>, transform_indices = @transform_6, window_bounds = array<i64: 1, 128>}, {transform_indices = @transform_7, window_bounds = array<i64: 16, 128>}]} {
    %c0 = arith.constant 0 : index
    %c0_0 = arith.constant 0 : index
    %0 = vector.load %arg1[%c0, %c0_0] : memref<16x400xbf16, #tpu.memory_space<vmem>>, vector<16x400xbf16>
    %c0_1 = arith.constant 0 : index
    %c0_2 = arith.constant 0 : index
    %1 = vector.load %arg2[%c0_1, %c0_2] : memref<400x128xbf16, #tpu.memory_space<vmem>>, vector<400x128xbf16>
    %cst = arith.constant dense<0.000000e+00> : vector<16x128xf32>
    %2 = tpu.matmul %0, %1, %cst {dimension_numbers = #tpu.dot_dimension_numbers<[1], [0], [0], [1], [0, 0, 1, 1], [], []>} : vector<16x400xbf16>, vector<400x128xbf16>, vector<16x128xf32> -> vector<16x128xf32>
    %c0_3 = arith.constant 0 : index
    %c0_4 = arith.constant 0 : index
    %3 = vector.load %arg3[%c0_3, %c0_4] : memref<1x128xf32, #tpu.memory_space<vmem>>, vector<1x128xf32>
    %4 = vector.broadcast %3 : vector<1x128xf32> to vector<16x128xf32>
    %5 = arith.addf %2, %4 : vector<16x128xf32>
    %6 = math.tanh %5 : vector<16x128xf32>
    %7 = arith.truncf %6 : vector<16x128xf32> to vector<16x128xbf16>
    %c0_5 = arith.constant 0 : index
    %c0_6 = arith.constant 0 : index
    %8 = vector.load %arg4[%c0_5, %c0_6] : memref<128x128xbf16, #tpu.memory_space<vmem>>, vector<128x128xbf16>
    %cst_7 = arith.constant dense<0.000000e+00> : vector<16x128xf32>
    %9 = tpu.matmul %7, %8, %cst_7 {dimension_numbers = #tpu.dot_dimension_numbers<[1], [0], [0], [1], [0, 0, 1, 1], [], []>} : vector<16x128xbf16>, vector<128x128xbf16>, vector<16x128xf32> -> vector<16x128xf32>
    %c0_8 = arith.constant 0 : index
    %c0_9 = arith.constant 0 : index
    %10 = vector.load %arg5[%c0_8, %c0_9] : memref<1x128xf32, #tpu.memory_space<vmem>>, vector<1x128xf32>
    %11 = vector.broadcast %10 : vector<1x128xf32> to vector<16x128xf32>
    %12 = arith.addf %9, %11 : vector<16x128xf32>
    %13 = math.tanh %12 : vector<16x128xf32>
    %14 = arith.truncf %13 : vector<16x128xf32> to vector<16x128xbf16>
    %c0_10 = arith.constant 0 : index
    %c0_11 = arith.constant 0 : index
    %15 = vector.load %arg6[%c0_10, %c0_11] : memref<128x128xbf16, #tpu.memory_space<vmem>>, vector<128x128xbf16>
    %cst_12 = arith.constant dense<0.000000e+00> : vector<16x128xf32>
    %16 = tpu.matmul %14, %15, %cst_12 {dimension_numbers = #tpu.dot_dimension_numbers<[1], [0], [0], [1], [0, 0, 1, 1], [], []>} : vector<16x128xbf16>, vector<128x128xbf16>, vector<16x128xf32> -> vector<16x128xf32>
    %c0_13 = arith.constant 0 : index
    %c0_14 = arith.constant 0 : index
    %17 = vector.load %arg7[%c0_13, %c0_14] : memref<1x128xf32, #tpu.memory_space<vmem>>, vector<1x128xf32>
    %18 = vector.broadcast %17 : vector<1x128xf32> to vector<16x128xf32>
    %19 = arith.addf %16, %18 : vector<16x128xf32>
    %c0_15 = arith.constant 0 : index
    %c0_16 = arith.constant 0 : index
    %20 = vector.load %arg8[%c0_15, %c0_16] : memref<16x128xf32, #tpu.memory_space<vmem>>, vector<16x128xf32>
    tpu.vector_store %arg8[%c0_15, %c0_16], %19 {strides = array<i32>} : memref<16x128xf32, #tpu.memory_space<vmem>>, vector<16x128xf32>,
    return
  }
  func.func @transform_0(%arg0: i32) -> (i32, i32) {
    %c0_i32 = arith.constant 0 : i32
    %c0_i32_0 = arith.constant 0 : i32
    return %arg0, %c0_i32 : i32, i32
  }
  func.func @transform_1(%arg0: i32) -> (i32, i32) {
    %c0_i32 = arith.constant 0 : i32
    %c0_i32_0 = arith.constant 0 : i32
    %c0_i32_1 = arith.constant 0 : i32
    return %c0_i32, %c0_i32_0 : i32, i32
  }
  func.func @transform_2(%arg0: i32) -> (i32, i32) {
    %c0_i32 = arith.constant 0 : i32
    %c0_i32_0 = arith.constant 0 : i32
    %c0_i32_1 = arith.constant 0 : i32
    return %c0_i32, %c0_i32_0 : i32, i32
  }
  func.func @transform_3(%arg0: i32) -> (i32, i32) {
    %c0_i32 = arith.constant 0 : i32
    %c0_i32_0 = arith.constant 0 : i32
    %c0_i32_1 = arith.constant 0 : i32
    return %c0_i32, %c0_i32_0 : i32, i32
  }
  func.func @transform_4(%arg0: i32) -> (i32, i32) {
    %c0_i32 = arith.constant 0 : i32
    %c0_i32_0 = arith.constant 0 : i32
    %c0_i32_1 = arith.constant 0 : i32
    return %c0_i32, %c0_i32_0 : i32, i32
  }
  func.func @transform_5(%arg0: i32) -> (i32, i32) {
    %c0_i32 = arith.constant 0 : i32
    %c0_i32_0 = arith.constant 0 : i32
    %c0_i32_1 = arith.constant 0 : i32
    return %c0_i32, %c0_i32_0 : i32, i32
  }
  func.func @transform_6(%arg0: i32) -> (i32, i32) {
    %c0_i32 = arith.constant 0 : i32
    %c0_i32_0 = arith.constant 0 : i32
    %c0_i32_1 = arith.constant 0 : i32
    return %c0_i32, %c0_i32_0 : i32, i32
  }
  func.func @transform_7(%arg0: i32) -> (i32, i32) {
    %c0_i32 = arith.constant 0 : i32
    %c0_i32_0 = arith.constant 0 : i32
    return %arg0, %c0_i32 : i32, i32
  }
}

</mosaic_0001>

<bundles_post_ra>
// kernel: lenet5_forward.3
= control target key start
LH: loop header
LB: loop body
LE: loop exit
PB: predicated region body
PF: predicated region fallthrough
CT: control target
= control target key end

     0   :  { %s2775_s12 = smov 0   ;;  %s2777_s13 = smov 0   ;;  %s3345_s0 = inlined_call_operand.vmem [shape: bf16[4,416,25], index: 0, kind: input, shape index: {}]   ;;  %s3346_s1 = inlined_call_operand.vmem [shape: bf16[25,128], index: 1, kind: input, shape index: {}]   ;;  %s3347_s2 = inlined_call_operand.vmem [shape: f32[1,128], index: 2, kind: input, shape index: {}]   ;;  %s3348_s3 = inlined_call_operand.vmem [shape: bf16[416,128], index: 3, kind: output, shape index: {}]  }
   0x1   :  { %s2779_s14 = smov 0  }
   0x2 LB: > { %s2029_s15 = sadd.s32 4294967295, %s2752_s14   ;;  %s2792_s16 = sadd.s32 1, %s2752_s14   ;;  %s2752_s14 = sphi %s2779_s14, %s3363_s14   ;;  %s2748_s13 = sphi %s2777_s13, %s3362_s13   ;;  %s2744_s12 = sphi %s2775_s12, %s3361_s12  }
   0x3   : > { %s17_s17 = ssub.s32 %s2752_s14, %s2792_s16  ;;  %s20_s18 = sadd.s32 1, %s2748_s13 }
   0x4   : > { %p18_p0 = scmp.eq.s32.totalorder %s17_s17, 0  ;;  %p27_p1 = scmp.ne.s32.totalorder %s2748_s13, %s2744_s12 }
   0x5   : > { %p28_p2 = scmp.eq.s32.totalorder %s2752_s14, 0  ;;  %p2032_p4 = scmp.ge.s32.totalorder %s2752_s14, 2 }
   0x6   : > { %s2801_s19 = scalar_select %p18_p0, %s2748_s13, %s20_s18  }
   0x7   : > { %p29_p3 = por %p28_p2, %p27_p1  ;;  %127 = sbr.rel (%p2032_p4) target bundleno = 43 (0x2b), region = 24 }
   0xc   : > { %130 = sbr.rel (!%p29_p3) target bundleno = 43 (0x2b), region = 28  ;;  %s132_s20 = sand.u32 (%p29_p3), 1, %s2748_s13  }
   0xd   : > { %s2171_s21 = smul.u32 (%p29_p3), 104, %s2752_s14 }
   0xe   : > { %s2441_s22 = smul.u32 (%p29_p3), 416, %s132_s20 }
   0xf   : > { %s2809_s25 = scalar_lea.vmem (%p29_p3), %s3345_s0, %s2171_s21 }
  0x10   : > { %v154_v0 = vld [vmem:[%s2809_s25] sm:$0xff] (%p29_p3)   ;;  %v158_v1 = vld [vmem:[%s2809_s25 + $0x8] sm:$0xff] (%p29_p3)   ;;  %v162_v2 = vld [vmem:[%s2809_s25 + $0x10] sm:$0xff] (%p29_p3)   ;;  %s2814_s26 = scalar_lea.vmem (%p29_p3), [#allocation2], %s2441_s22 }
  0x11   : > { %155 = vst [vmem:[%s2814_s26] sm:$0xff] %v154_v0   ;;  %159 = vst [vmem:[%s2814_s26 + $0x8] sm:$0xff] %v158_v1   ;;  %v166_v3 = vld [vmem:[%s2809_s25 + $0x18] sm:$0xff]   ;;  %v170_v4 = vld [vmem:[%s2809_s25 + $0x20] sm:$0xff]  }
  0x12   : > { %163 = vst [vmem:[%s2814_s26 + $0x10] sm:$0xff] %v162_v2   ;;  %v174_v5 = vld [vmem:[%s2809_s25 + $0x28] sm:$0xff]   ;;  %167 = vst [vmem:[%s2814_s26 + $0x18] sm:$0xff] %v166_v3   ;;  %v178_v6 = vld [vmem:[%s2809_s25 + $0x30] sm:$0xff]  }
  0x13   : > { %171 = vst [vmem:[%s2814_s26 + $0x20] sm:$0xff] %v170_v4   ;;  %175 = vst [vmem:[%s2814_s26 + $0x28] sm:$0xff] %v174_v5   ;;  %v182_v7 = vld [vmem:[%s2809_s25 + $0x38] sm:$0xff]   ;;  %v186_v8 = vld [vmem:[%s2809_s25 + $0x40] sm:$0xff]  }
  0x14   : > { %179 = vst [vmem:[%s2814_s26 + $0x30] sm:$0xff] %v178_v6   ;;  %183 = vst [vmem:[%s2814_s26 + $0x38] sm:$0xff] %v182_v7   ;;  %v190_v9 = vld [vmem:[%s2809_s25 + $0x48] sm:$0xff]   ;;  %v194_v10 = vld [vmem:[%s2809_s25 + $0x50] sm:$0xff]  }
  0x15   : > { %187 = vst [vmem:[%s2814_s26 + $0x40] sm:$0xff] %v186_v8   ;;  %v198_v11 = vld [vmem:[%s2809_s25 + $0x58] sm:$0xff]   ;;  %191 = vst [vmem:[%s2814_s26 + $0x48] sm:$0xff] %v190_v9   ;;  %v202_v12 = vld [vmem:[%s2809_s25 + $0x60] sm:$0xff]  }
  0x16   : > { %195 = vst [vmem:[%s2814_s26 + $0x50] sm:$0xff] %v194_v10   ;;  %199 = vst [vmem:[%s2814_s26 + $0x58] sm:$0xff] %v198_v11   ;;  %v206_v13 = vld [vmem:[%s2809_s25 + $0xd0] sm:$0xff]   ;;  %v210_v14 = vld [vmem:[%s2809_s25 + $0xd8] sm:$0xff]  }
  0x17   : > { %203 = vst [vmem:[%s2814_s26 + $0x60] sm:$0xff] %v202_v12   ;;  %207 = vst [vmem:[%s2814_s26 + $0x68] sm:$0xff] %v206_v13   ;;  %v214_v15 = vld [vmem:[%s2809_s25 + $0xe0] sm:$0xff]   ;;  %v218_v16 = vld [vmem:[%s2809_s25 + $0xe8] sm:$0xff]  }
  0x18   : > { %211 = vst [vmem:[%s2814_s26 + $0x70] sm:$0xff] %v210_v14   ;;  %v222_v17 = vld [vmem:[%s2809_s25 + $0xf0] sm:$0xff]   ;;  %215 = vst [vmem:[%s2814_s26 + $0x78] sm:$0xff] %v214_v15   ;;  %v226_v18 = vld [vmem:[%s2809_s25 + $0xf8] sm:$0xff]  }
  0x19   : > { %219 = vst [vmem:[%s2814_s26 + $0x80] sm:$0xff] %v218_v16   ;;  %223 = vst [vmem:[%s2814_s26 + $0x88] sm:$0xff] %v222_v17   ;;  %v230_v19 = vld [vmem:[%s2809_s25 + $0x100] sm:$0xff]   ;;  %v234_v20 = vld [vmem:[%s2809_s25 + $0x108] sm:$0xff]  }
  0x1a   : > { %227 = vst [vmem:[%s2814_s26 + $0x90] sm:$0xff] %v226_v18   ;;  %231 = vst [vmem:[%s2814_s26 + $0x98] sm:$0xff] %v230_v19   ;;  %v238_v21 = vld [vmem:[%s2809_s25 + $0x110] sm:$0xff]   ;;  %v242_v22 = vld [vmem:[%s2809_s25 + $0x118] sm:$0xff]  }
  0x1b   : > { %235 = vst [vmem:[%s2814_s26 + $0xa0] sm:$0xff] %v234_v20   ;;  %v246_v23 = vld [vmem:[%s2809_s25 + $0x120] sm:$0xff]   ;;  %239 = vst [vmem:[%s2814_s26 + $0xa8] sm:$0xff] %v238_v21   ;;  %v250_v24 = vld [vmem:[%s2809_s25 + $0x128] sm:$0xff]  }
  0x1c   : > { %243 = vst [vmem:[%s2814_s26 + $0xb0] sm:$0xff] %v242_v22   ;;  %247 = vst [vmem:[%s2814_s26 + $0xb8] sm:$0xff] %v246_v23   ;;  %v254_v25 = vld [vmem:[%s2809_s25 + $0x130] sm:$0xff]   ;;  %v258_v26 = vld [vmem:[%s2809_s25 + $0x1a0] sm:$0xff]  }
  0x1d   : > { %251 = vst [vmem:[%s2814_s26 + $0xc0] sm:$0xff] %v250_v24   ;;  %255 = vst [vmem:[%s2814_s26 + $0xc8] sm:$0xff] %v254_v25   ;;  %v262_v27 = vld [vmem:[%s2809_s25 + $0x1a8] sm:$0xff]   ;;  %v266_v28 = vld [vmem:[%s2809_s25 + $0x1b0] sm:$0xff]  }
  0x1e   : > { %259 = vst [vmem:[%s2814_s26 + $0xd0] sm:$0xff] %v258_v26   ;;  %v270_v29 = vld [vmem:[%s2809_s25 + $0x1b8] sm:$0xff]   ;;  %263 = vst [vmem:[%s2814_s26 + $0xd8] sm:$0xff] %v262_v27   ;;  %v274_v30 = vld [vmem:[%s2809_s25 + $0x1c0] sm:$0xff]  }
  0x1f   : > { %267 = vst [vmem:[%s2814_s26 + $0xe0] sm:$0xff] %v266_v28   ;;  %271 = vst [vmem:[%s2814_s26 + $0xe8] sm:$0xff] %v270_v29   ;;  %v278_v31 = vld [vmem:[%s2809_s25 + $0x1c8] sm:$0xff]   ;;  %v282_v32 = vld [vmem:[%s2809_s25 + $0x1d0] sm:$0xff]  }
  0x20   : > { %275 = vst [vmem:[%s2814_s26 + $0xf0] sm:$0xff] %v274_v30   ;;  %279 = vst [vmem:[%s2814_s26 + $0xf8] sm:$0xff] %v278_v31   ;;  %v286_v33 = vld [vmem:[%s2809_s25 + $0x1d8] sm:$0xff]   ;;  %v290_v34 = vld [vmem:[%s2809_s25 + $0x1e0] sm:$0xff]  }
  0x21   : > { %283 = vst [vmem:[%s2814_s26 + $0x100] sm:$0xff] %v282_v32   ;;  %v294_v35 = vld [vmem:[%s2809_s25 + $0x1e8] sm:$0xff]   ;;  %287 = vst [vmem:[%s2814_s26 + $0x108] sm:$0xff] %v286_v33   ;;  %v298_v36 = vld [vmem:[%s2809_s25 + $0x1f0] sm:$0xff]  }
  0x22   : > { %291 = vst [vmem:[%s2814_s26 + $0x110] sm:$0xff] %v290_v34   ;;  %295 = vst [vmem:[%s2814_s26 + $0x118] sm:$0xff] %v294_v35   ;;  %v302_v37 = vld [vmem:[%s2809_s25 + $0x1f8] sm:$0xff]   ;;  %v306_v38 = vld [vmem:[%s2809_s25 + $0x200] sm:$0xff]  }
  0x23   : > { %299 = vst [vmem:[%s2814_s26 + $0x120] sm:$0xff] %v298_v36   ;;  %303 = vst [vmem:[%s2814_s26 + $0x128] sm:$0xff] %v302_v37   ;;  %v310_v39 = vld [vmem:[%s2809_s25 + $0x270] sm:$0xff]   ;;  %v314_v40 = vld [vmem:[%s2809_s25 + $0x278] sm:$0xff]  }
  0x24   : > { %307 = vst [vmem:[%s2814_s26 + $0x130] sm:$0xff] %v306_v38   ;;  %v318_v41 = vld [vmem:[%s2809_s25 + $0x280] sm:$0xff]   ;;  %311 = vst [vmem:[%s2814_s26 + $0x138] sm:$0xff] %v310_v39   ;;  %v322_v42 = vld [vmem:[%s2809_s25 + $0x288] sm:$0xff]  }
  0x25   : > { %315 = vst [vmem:[%s2814_s26 + $0x140] sm:$0xff] %v314_v40   ;;  %319 = vst [vmem:[%s2814_s26 + $0x148] sm:$0xff] %v318_v41   ;;  %v326_v43 = vld [vmem:[%s2809_s25 + $0x290] sm:$0xff]   ;;  %v330_v44 = vld [vmem:[%s2809_s25 + $0x298] sm:$0xff]  }
  0x26   : > { %323 = vst [vmem:[%s2814_s26 + $0x150] sm:$0xff] %v322_v42   ;;  %327 = vst [vmem:[%s2814_s26 + $0x158] sm:$0xff] %v326_v43   ;;  %v334_v45 = vld [vmem:[%s2809_s25 + $0x2a0] sm:$0xff]   ;;  %v338_v46 = vld [vmem:[%s2809_s25 + $0x2a8] sm:$0xff]  }
  0x27   : > { %331 = vst [vmem:[%s2814_s26 + $0x160] sm:$0xff] %v330_v44   ;;  %v342_v47 = vld [vmem:[%s2809_s25 + $0x2b0] sm:$0xff]   ;;  %335 = vst [vmem:[%s2814_s26 + $0x168] sm:$0xff] %v334_v45   ;;  %v346_v48 = vld [vmem:[%s2809_s25 + $0x2b8] sm:$0xff]  }
  0x28   : > { %339 = vst [vmem:[%s2814_s26 + $0x170] sm:$0xff] %v338_v46   ;;  %343 = vst [vmem:[%s2814_s26 + $0x178] sm:$0xff] %v342_v47   ;;  %v350_v49 = vld [vmem:[%s2809_s25 + $0x2c0] sm:$0xff]   ;;  %v354_v50 = vld [vmem:[%s2809_s25 + $0x2c8] sm:$0xff]  }
  0x29   : > { %347 = vst [vmem:[%s2814_s26 + $0x180] sm:$0xff] %v346_v48   ;;  %351 = vst [vmem:[%s2814_s26 + $0x188] sm:$0xff] %v350_v49   ;;  %v358_v51 = vld [vmem:[%s2809_s25 + $0x2d0] sm:$0xff]  }
  0x2a   : > { %355 = vst [vmem:[%s2814_s26 + $0x190] sm:$0xff] %v354_v50   ;;  %359 = vst [vmem:[%s2814_s26 + $0x198] sm:$0xff] %v358_v51  }
  0x2b PF: > { %p2034_p5 = scmp.ge.s32.totalorder %s2752_s14, 1  ;;  %p592_p6 = scmp.lt.s32.totalorder %s2752_s14, 3 }
  0x2d   : > { %p593_p7 = pnand %p2034_p5, %p592_p6 }
  0x2f   : > { %596 = sbr.rel (%p593_p7) target bundleno = 395 (0x18b), region = 69 }
  0x34   : > { %v2468_v52 = vld [vmem:[%s3346_s1 + $0x8] sm:$0x1f]   ;;  %vm1173_vm0 = vcmask 1043456   ;;  %vm1174_vm1 = vcmask 1044480   ;;  %v2754_v53 = vmov 65535   ;;  %s599_s29 = sand.u32 1, %s2744_s12  }
  0x35   : > { %v1175_v54 = vsel %vm1173_vm0, 4294967295, %v2754_v53  ;;  %s2442_s30 = smul.u32 416, %s599_s29  ;;  %v2469_v57 = vld [vmem:[%s3346_s1] sm:$0xff]   ;;  %vm1016_vm2 = vcmask 203776  }
  0x36   : > { %v1176_v55 = vsel %vm1174_vm1, %v1175_v54, 0  ;;  %v3035_v48 = vld [vmem:[%s3347_s2] ss:$0 sm:$0xff]  ;;  %s3184_s9 = smul.u32 26, %s2029_s15 }
  0x37   : > { %v1178_v56 = vand.u32 %v2468_v52, %v1176_v55  ;;  %s2926_s6 = scalar_lea.vmem [#allocation2], %s2442_s30 }
  0x38   : > { %v2470_v58 = vld [vmem:[%s2926_s6] sm:$0xff]   ;;  %v2471_v59 = vld [vmem:[%s2926_s6 + $0xd0] sm:$0xff]   ;;  %v2472_v60 = vld [vmem:[%s2926_s6 + $0x8] sm:$0xff]   ;;  %p624_p8 = scmp.lt.s32.totalorder %s3184_s9, 51 }
  0x39   : > { %2329 = vmatprep.subr.bf16.mxu0 %v1178_v56  ;;  %2437 = vmatprep.subr.bf16.mxu1 %v1178_v56  ;;  %v2473_v61 = vld [vmem:[%s2926_s6 + $0xd8] sm:$0xff]   ;;  %v2474_v62 = vld [vmem:[%s2926_s6 + $0x10] sm:$0xff]   ;;  %v2475_v63 = vld [vmem:[%s2926_s6 + $0xe0] sm:$0xff]  }
  0x3a   : > { %2330 = vmatpush3.bf16.msra.mxu0 %v1178_v56  ;;  %2439 = vmatpush3.bf16.msra.mxu1 %v1178_v56  ;;  %v2476_v0 = vld [vmem:[%s2926_s6 + $0x18] sm:$0xff]   ;;  %v2477_v1 = vld [vmem:[%s2926_s6 + $0xe8] sm:$0xff]   ;;  %v2478_v2 = vld [vmem:[%s2926_s6 + $0x20] sm:$0xff]   ;;  %s3365_s9 = smov (!%p624_p8, %s3184_s9), 51 }
  0x3b   : > { %2331 = vmatprep.subr.bf16.mxu0 %v2469_v57  ;;  %2438 = vmatprep.subr.bf16.mxu1 %v2469_v57  ;;  %v2479_v3 = vld [vmem:[%s2926_s6 + $0xf0] sm:$0xff]   ;;  %v2480_v4 = vld [vmem:[%s2926_s6 + $0x28] sm:$0xff]   ;;  %v2481_v5 = vld [vmem:[%s2926_s6 + $0xf8] sm:$0xff]   ;;  %s2035_s10 = sshll.u32 %s3365_s9, 2 }
  0x3c   : > { %2333 = vmatprep.mubr.msk.bf16.mxu0 %vm1016_vm2, %v2470_v58  ;;  %2385 = vmatprep.mubr.msk.bf16.mxu1 %vm1016_vm2, %v2471_v59  ;;  %v2482_v6 = vld [vmem:[%s2926_s6 + $0x30] sm:$0xff]   ;;  %v2483_v7 = vld [vmem:[%s2926_s6 + $0x100] sm:$0xff]   ;;  %v2484_v8 = vld [vmem:[%s2926_s6 + $0x38] sm:$0xff]   ;;  %s3234_s14 = scalar_lea.vmem %s3348_s3, %s2035_s10 }
  0x3d   : > { %v2485_v9 = vld [vmem:[%s2926_s6 + $0x108] sm:$0xff]   ;;  %v2486_v10 = vld [vmem:[%s2926_s6 + $0x40] sm:$0xff]   ;;  %v2487_v11 = vld [vmem:[%s2926_s6 + $0x110] sm:$0xff]  }
  0x3e   : > { %2332 = vmatpush3.bf16.msra.mxu0 %v2469_v57  ;;  %2440 = vmatpush3.bf16.msra.mxu1 %v2469_v57  ;;  %v2488_v12 = vld [vmem:[%s2926_s6 + $0x48] sm:$0xff]   ;;  %v2489_v13 = vld [vmem:[%s2926_s6 + $0x118] sm:$0xff]   ;;  %v2490_v14 = vld [vmem:[%s2926_s6 + $0x50] sm:$0xff]  }
  0x3f   : > { %v2491_v15 = vld [vmem:[%s2926_s6 + $0x120] sm:$0xff]   ;;  %v2492_v16 = vld [vmem:[%s2926_s6 + $0x58] sm:$0xff]   ;;  %v2493_v17 = vld [vmem:[%s2926_s6 + $0x128] sm:$0xff]  }
  0x40   : > { %v2494_v18 = vld [vmem:[%s2926_s6 + $0x60] sm:$0xff]   ;;  %v2495_v19 = vld [vmem:[%s2926_s6 + $0x130] sm:$0xff]   ;;  %v2496_v20 = vld [vmem:[%s2926_s6 + $0x68] sm:$0xff]  }
  0x41   : > { %2334 = vmatmul.mubr.msk.bf16.vlgmr.msra.gmra.mxu0 %vm1016_vm2, %v2472_v60  ;;  %2386 = vmatmul.mubr.msk.bf16.vlgmr.msra.gmra.mxu1 %vm1016_vm2, %v2473_v61  ;;  %v2497_v21 = vld [vmem:[%s2926_s6 + $0x138] sm:$0xff]   ;;  %v2498_v22 = vld [vmem:[%s2926_s6 + $0x70] sm:$0xff]   ;;  %v2499_v23 = vld [vmem:[%s2926_s6 + $0x140] sm:$0xff]  }
  0x42   : > { %2337 = vmatprep.mubr.msk.bf16.mxu0 %vm1016_vm2, %v2474_v62  ;;  %2389 = vmatprep.mubr.msk.bf16.mxu1 %vm1016_vm2, %v2475_v63  ;;  %v2500_v24 = vld [vmem:[%s2926_s6 + $0x78] sm:$0xff]   ;;  %v2501_v25 = vld [vmem:[%s2926_s6 + $0x148] sm:$0xff]   ;;  %v2502_v26 = vld [vmem:[%s2926_s6 + $0x80] sm:$0xff]  }
  0x43   : > { %v2503_v27 = vld [vmem:[%s2926_s6 + $0x150] sm:$0xff]   ;;  %v2504_v28 = vld [vmem:[%s2926_s6 + $0x88] sm:$0xff]   ;;  %v2505_v29 = vld [vmem:[%s2926_s6 + $0x158] sm:$0xff]  }
  0x44   : > { %v2506_v30 = vld [vmem:[%s2926_s6 + $0x90] sm:$0xff]   ;;  %v2507_v31 = vld [vmem:[%s2926_s6 + $0x160] sm:$0xff]   ;;  %v2508_v32 = vld [vmem:[%s2926_s6 + $0x98] sm:$0xff]  }
  0x45   : > { %v2509_v33 = vld [vmem:[%s2926_s6 + $0x168] sm:$0xff]   ;;  %v2510_v34 = vld [vmem:[%s2926_s6 + $0xa0] sm:$0xff]   ;;  %v2511_v35 = vld [vmem:[%s2926_s6 + $0x170] sm:$0xff]  }
  0x46   : > { %v2512_v36 = vld [vmem:[%s2926_s6 + $0xa8] sm:$0xff]   ;;  %v2513_v37 = vld [vmem:[%s2926_s6 + $0x178] sm:$0xff]   ;;  %v2514_v38 = vld [vmem:[%s2926_s6 + $0xb0] sm:$0xff]  }
  0x47   : > { %v2515_v39 = vld [vmem:[%s2926_s6 + $0x180] sm:$0xff]   ;;  %v2516_v40 = vld [vmem:[%s2926_s6 + $0xb8] sm:$0xff]   ;;  %v2517_v41 = vld [vmem:[%s2926_s6 + $0x188] sm:$0xff]  }
  0x48   : > { %v2518_v42 = vld [vmem:[%s2926_s6 + $0xc0] sm:$0xff]   ;;  %v2519_v43 = vld [vmem:[%s2926_s6 + $0x190] sm:$0xff]   ;;  %v2520_v44 = vld [vmem:[%s2926_s6 + $0xc8] sm:$0xff]  }
  0x49   : > { %2338 = vmatmul.mubr.msk.bf16.gmra.mxu0 %vm1016_vm2, %v2476_v0  ;;  %2390 = vmatmul.mubr.msk.bf16.gmra.mxu1 %vm1016_vm2, %v2477_v1  ;;  %v2521_v45 = vld [vmem:[%s2926_s6 + $0x198] sm:$0xff]  }
  0x4a   : > { %2341 = vmatprep.mubr.msk.bf16.mxu0 %vm1016_vm2, %v2478_v2  ;;  %2393 = vmatprep.mubr.msk.bf16.mxu1 %vm1016_vm2, %v2479_v3 }
  0x51   : > { %2342 = vmatmul.mubr.msk.bf16.gmra.mxu0 %vm1016_vm2, %v2480_v4  ;;  %2394 = vmatmul.mubr.msk.bf16.gmra.mxu1 %vm1016_vm2, %v2481_v5 }
  0x52   : > { %2345 = vmatprep.mubr.msk.bf16.mxu0 %vm1016_vm2, %v2482_v6  ;;  %2397 = vmatprep.mubr.msk.bf16.mxu1 %vm1016_vm2, %v2483_v7 }
  0x59   : > { %2346 = vmatmul.mubr.msk.bf16.gmra.mxu0 %vm1016_vm2, %v2484_v8  ;;  %2398 = vmatmul.mubr.msk.bf16.gmra.mxu1 %vm1016_vm2, %v2485_v9 }
  0x5a   : > { %2349 = vmatprep.mubr.msk.bf16.mxu0 %vm1016_vm2, %v2486_v10  ;;  %2401 = vmatprep.mubr.msk.bf16.mxu1 %vm1016_vm2, %v2487_v11 }
  0x61   : > { %2350 = vmatmul.mubr.msk.bf16.gmra.mxu0 %vm1016_vm2, %v2488_v12  ;;  %2402 = vmatmul.mubr.msk.bf16.gmra.mxu1 %vm1016_vm2, %v2489_v13 }
  0x62   : > { %2353 = vmatprep.mubr.msk.bf16.mxu0 %vm1016_vm2, %v2490_v14  ;;  %2405 = vmatprep.mubr.msk.bf16.mxu1 %vm1016_vm2, %v2491_v15 }
  0x69   : > { %2354 = vmatmul.mubr.msk.bf16.gmra.mxu0 %vm1016_vm2, %v2492_v16  ;;  %2406 = vmatmul.mubr.msk.bf16.gmra.mxu1 %vm1016_vm2, %v2493_v17 }
  0x6a   : > { %2357 = vmatprep.mubr.msk.bf16.mxu0 %vm1016_vm2, %v2494_v18  ;;  %2409 = vmatprep.mubr.msk.bf16.mxu1 %vm1016_vm2, %v2495_v19 }
  0x71   : > { %2358 = vmatmul.mubr.msk.bf16.gmra.mxu0 %vm1016_vm2, %v2496_v20  ;;  %2410 = vmatmul.mubr.msk.bf16.gmra.mxu1 %vm1016_vm2, %v2497_v21 }
  0x72   : > { %2361 = vmatprep.mubr.msk.bf16.mxu0 %vm1016_vm2, %v2498_v22  ;;  %2413 = vmatprep.mubr.msk.bf16.mxu1 %vm1016_vm2, %v2499_v23 }
  0x79   : > { %2362 = vmatmul.mubr.msk.bf16.gmra.mxu0 %vm1016_vm2, %v2500_v24  ;;  %2414 = vmatmul.mubr.msk.bf16.gmra.mxu1 %vm1016_vm2, %v2501_v25 }
  0x7a   : > { %2365 = vmatprep.mubr.msk.bf16.mxu0 %vm1016_vm2, %v2502_v26  ;;  %2417 = vmatprep.mubr.msk.bf16.mxu1 %vm1016_vm2, %v2503_v27 }
  0x81   : > { %2366 = vmatmul.mubr.msk.bf16.gmra.mxu0 %vm1016_vm2, %v2504_v28  ;;  %2418 = vmatmul.mubr.msk.bf16.gmra.mxu1 %vm1016_vm2, %v2505_v29 }
  0x82   : > { %2369 = vmatprep.mubr.msk.bf16.mxu0 %vm1016_vm2, %v2506_v30  ;;  %2421 = vmatprep.mubr.msk.bf16.mxu1 %vm1016_vm2, %v2507_v31 }
  0x89   : > { %2370 = vmatmul.mubr.msk.bf16.gmra.mxu0 %vm1016_vm2, %v2508_v32  ;;  %2422 = vmatmul.mubr.msk.bf16.gmra.mxu1 %vm1016_vm2, %v2509_v33 }
  0x8a   : > { %2373 = vmatprep.mubr.msk.bf16.mxu0 %vm1016_vm2, %v2510_v34  ;;  %2425 = vmatprep.mubr.msk.bf16.mxu1 %vm1016_vm2, %v2511_v35 }
  0x91   : > { %2374 = vmatmul.mubr.msk.bf16.gmra.mxu0 %vm1016_vm2, %v2512_v36  ;;  %2426 = vmatmul.mubr.msk.bf16.gmra.mxu1 %vm1016_vm2, %v2513_v37 }
  0x92   : > { %2377 = vmatprep.mubr.msk.bf16.mxu0 %vm1016_vm2, %v2514_v38  ;;  %2429 = vmatprep.mubr.msk.bf16.mxu1 %vm1016_vm2, %v2515_v39 }
  0x99   : > { %2378 = vmatmul.mubr.msk.bf16.gmra.mxu0 %vm1016_vm2, %v2516_v40  ;;  %2430 = vmatmul.mubr.msk.bf16.gmra.mxu1 %vm1016_vm2, %v2517_v41 }
  0x9a   : > { %2381 = vmatprep.mubr.msk.bf16.mxu0 %vm1016_vm2, %v2518_v42  ;;  %2433 = vmatprep.mubr.msk.bf16.mxu1 %vm1016_vm2, %v2519_v43 }
  0xa1   : > { %2382 = vmatmul.mubr.msk.bf16.gmra.mxu0 %vm1016_vm2, %v2520_v44  ;;  %2434 = vmatmul.mubr.msk.bf16.gmra.mxu1 %vm1016_vm2, %v2521_v45 }
 0x101   : > { %v2335_v46 = vpop.f32.mrf.mxu0  ;;  %v2387_v47 = vpop.f32.mrf.mxu1 }
 0x102   : > { %v1223_v53 = vadd.f32 %v2335_v46, %v3035_v48  ;;  %v1431_v54 = vadd.f32 %v2387_v47, %v3035_v48 }
 0x103   : > { %v1214_v49 = vpop.f32.mrf.mxu0  ;;  %v1422_v50 = vpop.f32.mrf.mxu1 }
 0x104   : > { %v1215_v57 = vadd.f32 %v3035_v48, %v1214_v49  ;;  %v1423_v58 = vadd.f32 %v3035_v48, %v1422_v50  ;;  %2522 = vtanh.f32 %v1223_v53 }
 0x105   : > { %v2336_v51 = vpop.f32.mrf.mxu0  ;;  %v2388_v52 = vpop.f32.mrf.mxu1  ;;  %2524 = vtanh.f32 %v1431_v54 }
 0x106   : > { %v1226_v61 = vadd.f32 %v2336_v51, %v3035_v48  ;;  %v1434_v62 = vadd.f32 %v2388_v52, %v3035_v48  ;;  %2526 = vtanh.f32 %v1215_v57 }
 0x107   : > { %v1217_v55 = vpop.f32.mrf.mxu0  ;;  %v1425_v56 = vpop.f32.mrf.mxu1  ;;  %2528 = vtanh.f32 %v1423_v58 }
 0x108   : > { %v1218_v1 = vadd.f32 %v3035_v48, %v1217_v55  ;;  %v1426_v2 = vadd.f32 %v3035_v48, %v1425_v56  ;;  %2530 = vtanh.f32 %v1226_v61 }
 0x109   : > { %v2339_v59 = vpop.f32.mrf.mxu0  ;;  %v2391_v60 = vpop.f32.mrf.mxu1  ;;  %2532 = vtanh.f32 %v1434_v62 }
 0x10a   : > { %v1239_v5 = vadd.f32 %v2339_v59, %v3035_v48  ;;  %v1447_v6 = vadd.f32 %v2391_v60, %v3035_v48  ;;  %2534 = vtanh.f32 %v1218_v1 }
 0x10b   : > { %v1230_v63 = vpop.f32.mrf.mxu0  ;;  %v1438_v0 = vpop.f32.mrf.mxu1  ;;  %2536 = vtanh.f32 %v1426_v2 }
 0x10c   : > { %v1231_v9 = vadd.f32 %v3035_v48, %v1230_v63  ;;  %v1439_v10 = vadd.f32 %v3035_v48, %v1438_v0  ;;  %2538 = vtanh.f32 %v1239_v5 }
 0x10d   : > { %v2340_v3 = vpop.f32.mrf.mxu0  ;;  %v2392_v4 = vpop.f32.mrf.mxu1  ;;  %2540 = vtanh.f32 %v1447_v6 }
 0x10e   : > { %v1242_v13 = vadd.f32 %v2340_v3, %v3035_v48  ;;  %v1450_v14 = vadd.f32 %v2392_v4, %v3035_v48  ;;  %2542 = vtanh.f32 %v1231_v9 }
 0x10f   : > { %v1233_v7 = vpop.f32.mrf.mxu0  ;;  %v1441_v8 = vpop.f32.mrf.mxu1  ;;  %2544 = vtanh.f32 %v1439_v10 }
 0x110   : > { %v1234_v17 = vadd.f32 %v3035_v48, %v1233_v7  ;;  %v1442_v18 = vadd.f32 %v3035_v48, %v1441_v8  ;;  %2546 = vtanh.f32 %v1242_v13 }
 0x111   : > { %v2343_v11 = vpop.f32.mrf.mxu0  ;;  %v2395_v12 = vpop.f32.mrf.mxu1  ;;  %2548 = vtanh.f32 %v1450_v14 }
 0x112   : > { %v1255_v21 = vadd.f32 %v2343_v11, %v3035_v48  ;;  %v3054_v22 = vpop.eup %2522  ;;  %v1463_v23 = vadd.f32 %v2395_v12, %v3035_v48  ;;  %2550 = vtanh.f32 %v1234_v17 }
 0x113   : > { %v1246_v15 = vpop.f32.mrf.mxu0  ;;  %v1454_v16 = vpop.f32.mrf.mxu1  ;;  %2552 = vtanh.f32 %v1442_v18 }
 0x114   : > { %v3057_v26 = vpop.eup %2524  ;;  %v1247_v27 = vadd.f32 %v3035_v48, %v1246_v15  ;;  %v1455_v29 = vadd.f32 %v3035_v48, %v1454_v16  ;;  %2554 = vtanh.f32 %v1255_v21 }
 0x115   : > { %v2344_v19 = vpop.f32.mrf.mxu0  ;;  %v2396_v20 = vpop.f32.mrf.mxu1  ;;  %2556 = vtanh.f32 %v1463_v23 }
 0x116   : > { %v3060_v28 = vpop.eup %2526  ;;  %v1258_v33 = vadd.f32 %v2344_v19, %v3035_v48  ;;  %v1466_v35 = vadd.f32 %v2396_v20, %v3035_v48  ;;  %2558 = vtanh.f32 %v1247_v27 }
 0x117   : > { %v1249_v24 = vpop.f32.mrf.mxu0  ;;  %v1457_v25 = vpop.f32.mrf.mxu1 }
 0x118   : > { %v3063_v32 = vpop.eup %2528  ;;  %v1250_v39 = vadd.f32 %v3035_v48, %v1249_v24  ;;  %2560 = vtanh.f32 %v1455_v29  ;;  %v1458_v41 = vadd.f32 %v3035_v48, %v1457_v25 }
 0x119   : > { %v2347_v30 = vpop.f32.mrf.mxu0  ;;  %v2399_v31 = vpop.f32.mrf.mxu1 }
 0x11a   : > { %v3066_v34 = vpop.eup %2530  ;;  %2562 = vtanh.f32 %v1258_v33  ;;  %v1271_v45 = vadd.f32 %v2347_v30, %v3035_v48  ;;  %v1479_v47 = vadd.f32 %v2399_v31, %v3035_v48 }
 0x11b   : > { %v1262_v36 = vpop.f32.mrf.mxu0  ;;  %v1470_v37 = vpop.f32.mrf.mxu1 }
 0x11c   : > { %v3069_v38 = vpop.eup %2532  ;;  %2564 = vtanh.f32 %v1466_v35  ;;  %v1263_v52 = vadd.f32 %v3035_v48, %v1262_v36  ;;  %v1471_v54 = vadd.f32 %v3035_v48, %v1470_v37 }
 0x11d   : > { %v3072_v40 = vpop.eup %2534  ;;  %v2348_v42 = vpop.f32.mrf.mxu0  ;;  %2566 = vtanh.f32 %v1250_v39 }
 0x11e   : > { %v2400_v43 = vpop.f32.mrf.mxu1  ;;  %v3075_v44 = vpop.eup %2536  ;;  %2568 = vtanh.f32 %v1458_v41  ;;  %v1274_v58 = vadd.f32 %v2348_v42, %v3035_v48 }
 0x11f   : > { %v3078_v46 = vpop.eup %2538  ;;  %v1265_v49 = vpop.f32.mrf.mxu0  ;;  %2570 = vtanh.f32 %v1271_v45  ;;  %v1482_v60 = vadd.f32 %v2400_v43, %v3035_v48 }
 0x120   : > { %v1473_v50 = vpop.f32.mrf.mxu1  ;;  %v3081_v51 = vpop.eup %2540  ;;  %2572 = vtanh.f32 %v1479_v47  ;;  %v1266_v0 = vadd.f32 %v3035_v48, %v1265_v49 }
 0x121   : > { %v3084_v53 = vpop.eup %2542  ;;  %v2351_v55 = vpop.f32.mrf.mxu0  ;;  %2574 = vtanh.f32 %v1263_v52  ;;  %v1474_v2 = vadd.f32 %v3035_v48, %v1473_v50 }
 0x122   : > { %v2403_v56 = vpop.f32.mrf.mxu1  ;;  %v3087_v57 = vpop.eup %2544  ;;  %2576 = vtanh.f32 %v1471_v54  ;;  %v1287_v6 = vadd.f32 %v2351_v55, %v3035_v48 }
 0x123   : > { %v3090_v59 = vpop.eup %2546  ;;  %v1278_v61 = vpop.f32.mrf.mxu0  ;;  %2578 = vtanh.f32 %v1274_v58  ;;  %v1495_v8 = vadd.f32 %v2403_v56, %v3035_v48 }
 0x124   : > { %v1486_v62 = vpop.f32.mrf.mxu1  ;;  %v3093_v63 = vpop.eup %2548  ;;  %2580 = vtanh.f32 %v1482_v60  ;;  %v1279_v12 = vadd.f32 %v3035_v48, %v1278_v61 }
 0x125   : > { %v3096_v1 = vpop.eup %2550  ;;  %v2352_v3 = vpop.f32.mrf.mxu0  ;;  %2582 = vtanh.f32 %v1266_v0  ;;  %v1487_v14 = vadd.f32 %v3035_v48, %v1486_v62 }
 0x126   : > { %v2404_v4 = vpop.f32.mrf.mxu1  ;;  %v3099_v5 = vpop.eup %2552  ;;  %2584 = vtanh.f32 %v1474_v2  ;;  %v1290_v18 = vadd.f32 %v2352_v3, %v3035_v48 }
 0x127   : > { %v3102_v7 = vpop.eup %2554  ;;  %v1281_v9 = vpop.f32.mrf.mxu0  ;;  %2586 = vtanh.f32 %v1287_v6  ;;  %v1498_v20 = vadd.f32 %v2404_v4, %v3035_v48 }
 0x128   : > { %v1489_v10 = vpop.f32.mrf.mxu1  ;;  %v3105_v11 = vpop.eup %2556  ;;  %2588 = vtanh.f32 %v1495_v8  ;;  %v1282_v25 = vadd.f32 %v3035_v48, %v1281_v9 }
 0x129   : > { %v3108_v13 = vpop.eup %2558  ;;  %v2355_v15 = vpop.f32.mrf.mxu0  ;;  %2590 = vtanh.f32 %v1279_v12  ;;  %v1490_v29 = vadd.f32 %v3035_v48, %v1489_v10 }
 0x12a   : > { %v2407_v16 = vpop.f32.mrf.mxu1  ;;  %v3111_v17 = vpop.eup %2560  ;;  %2592 = vtanh.f32 %v1487_v14  ;;  %v1303_v35 = vadd.f32 %v2355_v15, %v3035_v48 }
 0x12b   : > { %v3114_v19 = vpop.eup %2562  ;;  %v1294_v21 = vpop.f32.mrf.mxu0  ;;  %2594 = vtanh.f32 %v1290_v18  ;;  %v1511_v37 = vadd.f32 %v2407_v16, %v3035_v48 }
 0x12c   : > { %v1502_v23 = vpop.f32.mrf.mxu1  ;;  %v3117_v24 = vpop.eup %2564  ;;  %2596 = vtanh.f32 %v1498_v20  ;;  %v1295_v45 = vadd.f32 %v3035_v48, %v1294_v21 }
 0x12d   : > { %v3120_v27 = vpop.eup %2566  ;;  %v2356_v30 = vpop.f32.mrf.mxu0  ;;  %2598 = vtanh.f32 %v1282_v25  ;;  %v1503_v52 = vadd.f32 %v3035_v48, %v1502_v23 }
 0x12e   : > { %v2408_v31 = vpop.f32.mrf.mxu1  ;;  %v3123_v33 = vpop.eup %2568  ;;  %2600 = vtanh.f32 %v1490_v29  ;;  %v1306_v0 = vadd.f32 %v2356_v30, %v3035_v48 }
 0x12f   : > { %v3126_v36 = vpop.eup %2570  ;;  %v1297_v39 = vpop.f32.mrf.mxu0  ;;  %2602 = vtanh.f32 %v1303_v35  ;;  %v1514_v6 = vadd.f32 %v2408_v31, %v3035_v48 }
 0x130   : > { %v3129_v41 = vpop.f32.mrf.mxu1  ;;  %v3131_v42 = vpop.eup %2572  ;;  %2604 = vtanh.f32 %v1511_v37  ;;  %v1298_v18 = vadd.f32 %v3035_v48, %v1297_v39 }
 0x131   : > { %v3133_v43 = vpop.eup %2574  ;;  %v2359_v47 = vpop.f32.mrf.mxu0 }
 0x132   : > { %v2411_v49 = vpop.f32.mrf.mxu1  ;;  %v3136_v50 = vpop.eup %2576  ;;  %v1319_v54 = vadd.f32 %v2359_v47, %v3035_v48 }
 0x133   : > { %v3140_v55 = vpop.eup %2578  ;;  %v1527_v56 = vadd.f32 %v2411_v49, %v3035_v48  ;;  %v3143_v58 = vpop.f32.mrf.mxu0 }
 0x134   : > { %v3145_v60 = vpop.f32.mrf.mxu1  ;;  %v3147_v61 = vpop.eup %2580  ;;  %2606 = vtanh.f32 %v1319_v54 }
 0x135   : > { %v3149_v62 = vpop.eup %2582  ;;  %2608 = vtanh.f32 %v1295_v45  ;;  %v2360_v2 = vpop.f32.mrf.mxu0 }
 0x136   : > { %v2412_v3 = vpop.f32.mrf.mxu1  ;;  %v3152_v4 = vpop.eup %2584  ;;  %2610 = vtanh.f32 %v1503_v52  ;;  %v1322_v8 = vadd.f32 %v2360_v2, %v3035_v48 }
 0x137   : > { %v3156_v9 = vpop.eup %2586  ;;  %2612 = vtanh.f32 %v1527_v56  ;;  %v1530_v10 = vadd.f32 %v2412_v3, %v3035_v48  ;;  %v3159_v12 = vpop.f32.mrf.mxu0 }
 0x138   : > { %v3161_v14 = vpop.f32.mrf.mxu1  ;;  %v3163_v15 = vpop.eup %2588  ;;  %2614 = vtanh.f32 %v1322_v8 }
 0x139   : > { %v3165_v16 = vpop.eup %2590  ;;  %2616 = vtanh.f32 %v1306_v0  ;;  %v2363_v20 = vpop.f32.mrf.mxu0 }
 0x13a   : > { %v2415_v21 = vpop.f32.mrf.mxu1  ;;  %v3168_v23 = vpop.eup %2592  ;;  %2618 = vtanh.f32 %v1514_v6  ;;  %v1335_v25 = vadd.f32 %v2363_v20, %v3035_v48 }
 0x13b   : > { %v3171_v29 = vpop.eup %2594  ;;  %2620 = vtanh.f32 %v1530_v10  ;;  %v1543_v30 = vadd.f32 %v2415_v21, %v3035_v48  ;;  %v1326_v31 = vpop.f32.mrf.mxu0 }
 0x13c   : > { %3349 = vst [vmem:[#allocation3_spill] sm:$0xff] %v3171_v29  ;;  %v1534_v35 = vpop.f32.mrf.mxu1  ;;  %v3174_v37 = vpop.eup %2596  ;;  %2622 = vtanh.f32 %v1335_v25  ;;  %v1327_v39 = vadd.f32 %v3035_v48, %v1326_v31 }
 0x13d   : > { %3350 = vst [vmem:[#allocation4_spill] sm:$0xff] %v3174_v37  ;;  %v3177_v45 = vpop.eup %2598  ;;  %2624 = vtanh.f32 %v1298_v18  ;;  %v1535_v47 = vadd.f32 %v3035_v48, %v1534_v35  ;;  %v2364_v49 = vpop.f32.mrf.mxu0 }
 0x13e   : > { %v2416_v52 = vpop.f32.mrf.mxu1  ;;  %v3180_v54 = vpop.eup %2600  ;;  %2626 = vtanh.f32 %v1327_v39  ;;  %v1338_v56 = vadd.f32 %v2364_v49, %v3035_v48 }
 0x13f   : > { %v3187_v0 = vpop.eup %2602  ;;  %2628 = vtanh.f32 %v1543_v30  ;;  %v1546_v2 = vadd.f32 %v2416_v52, %v3035_v48  ;;  %v1329_v3 = vpop.f32.mrf.mxu0 }
 0x140   : > { %3351 = vst [vmem:[#allocation5_spill] sm:$0xff] %v3187_v0  ;;  %v1537_v6 = vpop.f32.mrf.mxu1  ;;  %v3190_v8 = vpop.eup %2604  ;;  %2630 = vtanh.f32 %v1338_v56  ;;  %v1330_v10 = vadd.f32 %v3035_v48, %v1329_v3 }
 0x141   : > { %3352 = vst [vmem:[#allocation6_spill] sm:$0xff] %v3190_v8  ;;  %v2607_v18 = vpop.eup %2606  ;;  %2632 = vtanh.f32 %v1535_v47  ;;  %v1538_v20 = vadd.f32 %v3035_v48, %v1537_v6  ;;  %v2367_v21 = vpop.f32.mrf.mxu0 }
 0x142   : > { %v2419_v25 = vpop.f32.mrf.mxu1  ;;  %v3194_v31 = vpop.eup %2608  ;;  %v1733_v35 = vadd.f32 %v2607_v18, %v3060_v28  ;;  %2634 = vtanh.f32 %v1330_v10  ;;  %v1351_v30 = vadd.f32 %v2367_v21, %v3035_v48  ;;  %v1506_v10 = vadd.f32 %v3035_v48, %v3129_v41 }
 0x143   : > { %v3199_v39 = vpop.eup %2610  ;;  %2636 = vtanh.f32 %v1546_v2  ;;  %v1559_v49 = vadd.f32 %v2419_v25, %v3035_v48  ;;  %v1342_v47 = vpop.f32.mrf.mxu0 }
 0x144   : > { %v1550_v52 = vpop.f32.mrf.mxu1  ;;  %v2613_v56 = vpop.eup %2612  ;;  %v1734_v3 = vadd.f32 %v3063_v32, %v1733_v35  ;;  %2638 = vtanh.f32 %v1351_v30  ;;  %v1343_v6 = vadd.f32 %v3035_v48, %v1342_v47 }
 0x145   : > { %v2615_v28 = vpop.eup %2614  ;;  %2640 = vtanh.f32 %v1538_v20  ;;  %v2368_v18 = vpop.f32.mrf.mxu0  ;;  %v1551_v41 = vadd.f32 %v3035_v48, %v1550_v52 }
 0x146   : > { %v2420_v21 = vpop.f32.mrf.mxu1  ;;  %v3206_v8 = vpop.eup %2616  ;;  %v1736_v2 = vadd.f32 %v2615_v28, %v3072_v40  ;;  %2642 = vtanh.f32 %v1343_v6  ;;  %v1354_v32 = vadd.f32 %v2368_v18, %v3035_v48  ;;  %v1735_v35 = vadd.f32 %v2613_v56, %v1734_v3 }
 0x147   : > { %3353 = vst [vmem:[#allocation7_spill] sm:$0xff] %v3206_v8  ;;  %v3215_v25 = vpop.eup %2618  ;;  %2644 = vtanh.f32 %v1559_v49  ;;  %v1345_v20 = vpop.f32.mrf.mxu0  ;;  %v1562_v6 = vadd.f32 %v2420_v21, %v3035_v48 }
 0x148   : > { %3354 = vst [vmem:[#allocation8_spill] sm:$0xff] %v3215_v25  ;;  %v1553_v30 = vpop.f32.mrf.mxu1  ;;  %v2621_v47 = vpop.eup %2620  ;;  %v1737_v8 = vadd.f32 %v3075_v44, %v1736_v2  ;;  %2646 = vtanh.f32 %v1354_v32  ;;  %v1346_v40 = vadd.f32 %v3035_v48, %v1345_v20  ;;  %v1811_v32 = vmul.f32 0.25, %v1735_v35 }
 0x149   : > { %v2623_v28 = vpop.eup %2622  ;;  %2648 = vtanh.f32 %v1506_v10  ;;  %v1554_v18 = vadd.f32 %v3035_v48, %v1553_v30  ;;  %v2371_v25 = vpop.f32.mrf.mxu0  ;;  %v1311_v10 = vadd.f32 %v3035_v48, %v3143_v58 }
 0x14a   : > { %v2423_v56 = vpop.f32.mrf.mxu1  ;;  %v3222_v3 = vpop.eup %2624  ;;  %v1738_v49 = vadd.f32 %v2621_v47, %v1737_v8  ;;  %v1745_v52 = vadd.f32 %v2623_v28, %v3084_v53  ;;  %2650 = vtanh.f32 %v1346_v40  ;;  %v1367_v44 = vadd.f32 %v2371_v25, %v3035_v48 }
 0x14b   : > { %v2627_v2 = vpop.eup %2626  ;;  %2652 = vtanh.f32 %v1551_v41  ;;  %v1358_v21 = vpop.f32.mrf.mxu0  ;;  %v1575_v53 = vadd.f32 %v2423_v56, %v3035_v48 }
 0x14c   : > { %v1566_v20 = vpop.f32.mrf.mxu1  ;;  %v2629_v30 = vpop.eup %2628  ;;  %v1812_v0 = vmul.f32 0.25, %v1738_v49  ;;  %v1746_v37 = vadd.f32 %v3087_v57, %v1745_v52  ;;  %v1739_v29 = vadd.f32 %v2627_v2, %v3054_v22  ;;  %2654 = vtanh.f32 %v1367_v44 }
 0x14d   : > { %v2631_v8 = vpop.eup %2630  ;;  %2656 = vtanh.f32 %v1562_v6  ;;  %v1359_v58 = vadd.f32 %v3035_v48, %v1358_v21  ;;  %v2372_v25 = vpop.f32.mrf.mxu0 }
 0x14e   : > { %v2424_v35 = vpop.f32.mrf.mxu1  ;;  %v2633_v41 = vpop.eup %2632  ;;  %v2201_v47 = vpack.c.bf16 %v1812_v0, %v1811_v32  ;;  %v1740_v57 = vadd.f32 %v3057_v26, %v1739_v29  ;;  %v1748_v22 = vadd.f32 %v2631_v8, %v3096_v1  ;;  %2658 = vtanh.f32 %v1554_v18 }
 0x14f   : > { %v2635_v40 = vpop.eup %2634  ;;  %v1747_v28 = vadd.f32 %v2629_v30, %v1746_v37  ;;  %2660 = vtanh.f32 %v1359_v58  ;;  %v1370_v49 = vadd.f32 %v2372_v25, %v3035_v48  ;;  %v1361_v6 = vpop.f32.mrf.mxu0  ;;  %v1567_v26 = vadd.f32 %v3035_v48, %v1566_v20 }
 0x150   : > { %v1569_v52 = vpop.f32.mrf.mxu1  ;;  %v2637_v56 = vpop.eup %2636  ;;  %2662 = vtanh.f32 %v1311_v10  ;;  %2202 = vst [vmem:[%s3234_s14] sm:$0xff] %v2201_v47   ;;  %v1749_v44 = vadd.f32 %v3099_v5, %v1748_v22  ;;  %v1742_v2 = vadd.f32 %v2635_v40, %v3066_v34  ;;  %v1741_v32 = vadd.f32 %v2633_v41, %v1740_v57 }
 0x151   : > { %v2639_v0 = vpop.eup %2638  ;;  %2664 = vtanh.f32 %v1575_v53  ;;  %v2375_v1 = vpop.f32.mrf.mxu0  ;;  %v1578_v10 = vadd.f32 %v2424_v35, %v3035_v48  ;;  %v1815_v58 = vmul.f32 0.25, %v1747_v28  ;;  %v1362_v34 = vadd.f32 %v3035_v48, %v1361_v6 }
 0x152   : > { %v2427_v29 = vpop.f32.mrf.mxu1  ;;  %v2641_v37 = vpop.eup %2640  ;;  %v1750_v18 = vadd.f32 %v2637_v56, %v1749_v44  ;;  %v1743_v21 = vadd.f32 %v3069_v38, %v1742_v2  ;;  %v1757_v30 = vadd.f32 %v2639_v0, %v3108_v13  ;;  %2666 = vtanh.f32 %v1370_v49 }
 0x153   : > { %v2643_v8 = vpop.eup %2642  ;;  %v1374_v5 = vpop.f32.mrf.mxu0  ;;  %v1519_v38 = vadd.f32 %v3035_v48, %v3145_v60  ;;  %v1813_v13 = vmul.f32 0.25, %v1741_v32  ;;  %2668 = vtanh.f32 %v1567_v26  ;;  %v1383_v35 = vadd.f32 %v2375_v1, %v3035_v48 }
 0x154   : > { %v1582_v25 = vpop.f32.mrf.mxu1  ;;  %v2645_v53 = vpop.eup %2644  ;;  %v1816_v41 = vmul.f32 0.25, %v1750_v18  ;;  %v1744_v20 = vadd.f32 %v2641_v37, %v1743_v21  ;;  %v1758_v47 = vadd.f32 %v3111_v17, %v1757_v30  ;;  %v1751_v57 = vadd.f32 %v2643_v8, %v3078_v46 }
 0x155   : > { %v2647_v22 = vpop.eup %2646  ;;  %v2376_v40 = vpop.f32.mrf.mxu0  ;;  %2670 = vtanh.f32 %v1578_v10  ;;  %v1570_v60 = vadd.f32 %v3035_v48, %v1569_v52  ;;  %v1375_v18 = vadd.f32 %v3035_v48, %v1374_v5 }
 0x156   : > { %v2428_v28 = vpop.f32.mrf.mxu1  ;;  %v3254_v49 = vpop.eup %2648  ;;  %v2211_v6 = vpack.c.bf16 %v1816_v41, %v1815_v58  ;;  %v1814_v56 = vmul.f32 0.25, %v1744_v20  ;;  %v1752_v44 = vadd.f32 %v3081_v51, %v1751_v57  ;;  %v1760_v46 = vadd.f32 %v2647_v22, %v3120_v27 }
 0x157   : > { %v2651_v17 = vpop.eup %2650  ;;  %2672 = vtanh.f32 %v1362_v34  ;;  %v1377_v2 = vpop.f32.mrf.mxu0  ;;  %v1759_v1 = vadd.f32 %v2645_v53, %v1758_v47  ;;  %v1591_v27 = vadd.f32 %v2427_v29, %v3035_v48  ;;  %v1583_v41 = vadd.f32 %v3035_v48, %v1582_v25 }
 0x158   : > { %v1585_v0 = vpop.f32.mrf.mxu1  ;;  %v2653_v32 = vpop.eup %2652  ;;  %2264 = vst [vmem:[%s3234_s14 + $0x10] sm:$0xff] %v2211_v6   ;;  %v2206_v26 = vpack.c.bf16 %v1814_v56, %v1813_v13  ;;  %v1754_v37 = vadd.f32 %v2651_v17, %v3090_v59  ;;  %2674 = vtanh.f32 %v1519_v38  ;;  %v1761_v30 = vadd.f32 %v3123_v33, %v1760_v46 }
 0x159   : > { %v2655_v21 = vpop.eup %2654  ;;  %v1753_v51 = vadd.f32 %v2653_v32, %v1752_v44  ;;  %v2379_v10 = vpop.f32.mrf.mxu0  ;;  %2676 = vtanh.f32 %v1383_v35  ;;  %v1386_v59 = vadd.f32 %v2376_v40, %v3035_v48  ;;  %v1594_v33 = vadd.f32 %v2428_v28, %v3035_v48 }
 0x15a   : > { %v2431_v52 = vpop.f32.mrf.mxu1  ;;  %v2657_v8 = vpop.eup %2656  ;;  %2263 = vst [vmem:[%s3234_s14 + $0x8] sm:$0xff] %v2206_v26   ;;  %v1755_v58 = vadd.f32 %v3093_v63, %v1754_v37  ;;  %v1769_v34 = vadd.f32 %v2655_v21, %v3133_v43  ;;  %2678 = vtanh.f32 %v1570_v60  ;;  %v1819_v57 = vmul.f32 0.25, %v1759_v1 }
 0x15b   : > { %v2659_v53 = vpop.eup %2658  ;;  %v1762_v5 = vadd.f32 %v2657_v8, %v1761_v30  ;;  %v1390_v20 = vpop.f32.mrf.mxu0  ;;  %2680 = vtanh.f32 %v1375_v18  ;;  %v1378_v63 = vadd.f32 %v3035_v48, %v1377_v2  ;;  %v1817_v43 = vmul.f32 0.25, %v1753_v51 }
 0x15c   : > { %v1598_v29 = vpop.f32.mrf.mxu1  ;;  %v2661_v47 = vpop.eup %2660  ;;  %v1756_v22 = vadd.f32 %v2659_v53, %v1755_v58  ;;  %2682 = vtanh.f32 %v1591_v27  ;;  %v1770_v56 = vadd.f32 %v3136_v50, %v1769_v34  ;;  %v1399_v44 = vadd.f32 %v2379_v10, %v3035_v48 }
 0x15d   : > { %v3271_v38 = vpop.eup %2662  ;;  %v1820_v13 = vmul.f32 0.25, %v1762_v5  ;;  %v1763_v35 = vadd.f32 %v2661_v47, %v3102_v7  ;;  %v2380_v40 = vpop.f32.mrf.mxu0  ;;  %2684 = vtanh.f32 %v1386_v59  ;;  %v1586_v60 = vadd.f32 %v3035_v48, %v1585_v0 }
 0x15e   : > { %v2432_v6 = vpop.f32.mrf.mxu1  ;;  %v2665_v25 = vpop.eup %2664  ;;  %v1818_v28 = vmul.f32 0.25, %v1756_v22  ;;  %2686 = vtanh.f32 %v1583_v41  ;;  %v1391_v1 = vadd.f32 %v3035_v48, %v1390_v20  ;;  %v1607_v37 = vadd.f32 %v2431_v52, %v3035_v48 }
 0x15f   : > { %v2221_v17 = vpack.c.bf16 %v1820_v13, %v1819_v57  ;;  %v1764_v46 = vadd.f32 %v3105_v11, %v1763_v35  ;;  %v1393_v2 = vpop.f32.mrf.mxu0  ;;  %v2667_v32 = vpop.eup %2666  ;;  %2688 = vtanh.f32 %v1378_v63  ;;  %v1771_v11 = vadd.f32 %v2665_v25, %v1770_v56 }
 0x160   : > { %v1601_v7 = vpop.f32.mrf.mxu1  ;;  %v2216_v26 = vpack.c.bf16 %v1818_v28, %v1817_v43  ;;  %v1772_v50 = vadd.f32 %v2667_v32, %v3149_v62  ;;  %2690 = vtanh.f32 %v1594_v33  ;;  %v2669_v21 = vpop.eup %2668  ;;  %v1402_v0 = vadd.f32 %v2380_v40, %v3035_v48 }
 0x161   : > { %2266 = vst [vmem:[%s3234_s14 + $0x20] sm:$0xff] %v2221_v17   ;;  %v2383_v18 = vpop.f32.mrf.mxu0  ;;  %2692 = vtanh.f32 %v1399_v44  ;;  %v1599_v27 = vadd.f32 %v3035_v48, %v1598_v29  ;;  %v1394_v62 = vadd.f32 %v3035_v48, %v1393_v2  ;;  %v1610_v59 = vadd.f32 %v2432_v6, %v3035_v48 }
 0x162   : > { %2265 = vst [vmem:[%s3234_s14 + $0x18] sm:$0xff] %v2216_v26   ;;  %v2671_v51 = vpop.eup %2670  ;;  %v1773_v30 = vadd.f32 %v3152_v4, %v1772_v50  ;;  %2694 = vtanh.f32 %v1586_v60  ;;  %v2435_v10 = vpop.f32.mrf.mxu1  ;;  %v1823_v5 = vmul.f32 0.25, %v1771_v11  ;;  %v1765_v41 = vadd.f32 %v2669_v21, %v1764_v46 }
 0x163   : > { %2696 = vtanh.f32 %v1391_v1  ;;  %v1406_v58 = vpop.f32.mrf.mxu0  ;;  %v1415_v4 = vadd.f32 %v2383_v18, %v3035_v48  ;;  %v1602_v47 = vadd.f32 %v3035_v48, %v1601_v7  ;;  %v1314_v35 = vadd.f32 %v3035_v48, %v3159_v12 }
 0x164   : > { %v2673_v8 = vpop.eup %2672  ;;  %v1774_v52 = vadd.f32 %v2671_v51, %v1773_v30  ;;  %2698 = vtanh.f32 %v1607_v37  ;;  %v1614_v57 = vpop.f32.mrf.mxu1  ;;  %v1407_v63 = vadd.f32 %v3035_v48, %v1406_v58  ;;  %v1821_v44 = vmul.f32 0.25, %v1765_v41 }
 0x165   : > { %v1766_v34 = vadd.f32 %v2673_v8, %v3114_v19  ;;  %v3289_v53 = vpop.eup %2674  ;;  %2700 = vtanh.f32 %v1402_v0  ;;  %v2384_v43 = vpop.f32.mrf.mxu0  ;;  %v1522_v32 = vadd.f32 %v3035_v48, %v3161_v14 }
 0x166   : > { %v2677_v33 = vpop.eup %2676  ;;  %v1824_v20 = vmul.f32 0.25, %v1774_v52  ;;  %2702 = vtanh.f32 %v1599_v27  ;;  %v1418_v46 = vadd.f32 %v2384_v43, %v3035_v48  ;;  %v2436_v60 = vpop.f32.mrf.mxu1 }
 0x167   : > { %v1767_v29 = vadd.f32 %v3117_v24, %v1766_v34  ;;  %v2679_v22 = vpop.eup %2678  ;;  %v1781_v19 = vadd.f32 %v2677_v33, %v3165_v16  ;;  %2704 = vtanh.f32 %v1394_v62  ;;  %v1623_v16 = vadd.f32 %v2435_v10, %v3035_v48 }
 0x168   : > { %v2681_v13 = vpop.eup %2680  ;;  %v2231_v40 = vpack.c.bf16 %v1824_v20, %v1823_v5  ;;  %2706 = vtanh.f32 %v1610_v59  ;;  %v1626_v21 = vadd.f32 %v2436_v60, %v3035_v48  ;;  %v1617_v27 = vpop.f32.mrf.mxu1 }
 0x169   : > { %v1768_v6 = vadd.f32 %v2679_v22, %v1767_v29  ;;  %v2683_v24 = vpop.eup %2682  ;;  %v1782_v25 = vadd.f32 %v3168_v23, %v1781_v19  ;;  %v1775_v28 = vadd.f32 %v2681_v13, %v3126_v36  ;;  %2708 = vtanh.f32 %v1415_v4  ;;  %v1409_v23 = vpop.f32.mrf.mxu0  ;;  %v3356_v13 = vld [vmem:[#allocation4_spill] sm:$0xff] }
 0x16a   : > { %v2685_v56 = vpop.eup %2684  ;;  %2268 = vst [vmem:[%s3234_s14 + $0x30] sm:$0xff] %v2231_v40   ;;  %2710 = vtanh.f32 %v1602_v47 }
 0x16b   : > { %v1822_v17 = vmul.f32 0.25, %v1768_v6  ;;  %v2687_v12 = vpop.eup %2686  ;;  %v1776_v2 = vadd.f32 %v3131_v42, %v1775_v28  ;;  %v1784_v7 = vadd.f32 %v2685_v56, %v3177_v45  ;;  %2712 = vtanh.f32 %v1407_v63 }
 0x16c   : > { %v2689_v36 = vpop.eup %2688  ;;  %2714 = vtanh.f32 %v1314_v35  ;;  %v1783_v1 = vadd.f32 %v2683_v24, %v1782_v25  ;;  %v1410_v45 = vadd.f32 %v3035_v48, %v1409_v23  ;;  %v3357_v25 = vld [vmem:[#allocation5_spill] sm:$0xff] }
 0x16d   : > { %v2226_v26 = vpack.c.bf16 %v1822_v17, %v1821_v44  ;;  %v2691_v50 = vpop.eup %2690  ;;  %v1785_v37 = vadd.f32 %v3180_v54, %v1784_v7  ;;  %v1778_v18 = vadd.f32 %v2689_v36, %v3140_v55  ;;  %2716 = vtanh.f32 %v1623_v16 }
 0x16e   : > { %v2693_v42 = vpop.eup %2692  ;;  %2718 = vtanh.f32 %v1418_v46  ;;  %v1777_v0 = vadd.f32 %v2687_v12, %v1776_v2  ;;  %v1827_v54 = vmul.f32 0.25, %v1783_v1  ;;  %v1615_v55 = vadd.f32 %v3035_v48, %v1614_v57  ;;  %v3355_v57 = vld [vmem:[#allocation3_spill] sm:$0xff]  ;;  %v3358_v12 = vld [vmem:[#allocation6_spill] sm:$0xff] }
 0x16f   : > { %2267 = vst [vmem:[%s3234_s14 + $0x28] sm:$0xff] %v2226_v26   ;;  %v2695_v11 = vpop.eup %2694  ;;  %v1786_v51 = vadd.f32 %v2691_v50, %v1785_v37  ;;  %v1779_v14 = vadd.f32 %v3147_v61, %v1778_v18  ;;  %v1793_v30 = vadd.f32 %v2693_v42, %v3194_v31  ;;  %2720 = vtanh.f32 %v1522_v32  ;;  %v3359_v18 = vld [vmem:[#allocation7_spill] sm:$0xff] }
 0x170   : > { %v2697_v10 = vpop.eup %2696  ;;  %2722 = vtanh.f32 %v1626_v21  ;;  %v1618_v61 = vadd.f32 %v3035_v48, %v1617_v27  ;;  %v1825_v5 = vmul.f32 0.25, %v1777_v0  ;;  %v3360_v0 = vld [vmem:[#allocation8_spill] sm:$0xff] }
 0x171   : > { %v2699_v8 = vpop.eup %2698  ;;  %v1828_v62 = vmul.f32 0.25, %v1786_v51  ;;  %v1780_v58 = vadd.f32 %v2695_v11, %v1779_v14  ;;  %v1787_v52 = vadd.f32 %v2697_v10, %v3156_v9  ;;  %v1794_v59 = vadd.f32 %v3199_v39, %v1793_v30 }
 0x172   : > { %v2701_v34 = vpop.eup %2700  ;;  %2724 = vtanh.f32 %v1410_v45 }
 0x173   : > { %v2703_v31 = vpop.eup %2702  ;;  %v2241_v41 = vpack.c.bf16 %v1828_v62, %v1827_v54  ;;  %v1826_v4 = vmul.f32 0.25, %v1780_v58  ;;  %v1788_v33 = vadd.f32 %v3163_v15, %v1787_v52  ;;  %v1796_v29 = vadd.f32 %v2701_v34, %v3222_v3 }
 0x174   : > { %v2705_v20 = vpop.eup %2704  ;;  %2726 = vtanh.f32 %v1615_v55  ;;  %v1795_v19 = vadd.f32 %v2699_v8, %v1794_v59 }
 0x175   : > { %v2707_v47 = vpop.eup %2706  ;;  %2270 = vst [vmem:[%s3234_s14 + $0x40] sm:$0xff] %v2241_v41   ;;  %v2236_v9 = vpack.c.bf16 %v1826_v4, %v1825_v5  ;;  %v1790_v22 = vadd.f32 %v2705_v20, %v3355_v57  ;;  %v1797_v48 = vadd.f32 %v3254_v49, %v1796_v29  ;;  %2728 = vtanh.f32 %v1618_v61 }
 0x176   : > { %v2709_v39 = vpop.eup %2708  ;;  %v1789_v43 = vadd.f32 %v2703_v31, %v1788_v33  ;;  %v1831_v56 = vmul.f32 0.25, %v1795_v19 }
 0x177   : > { %v2711_v63 = vpop.eup %2710  ;;  %2269 = vst [vmem:[%s3234_s14 + $0x38] sm:$0xff] %v2236_v9   ;;  %v1791_v35 = vadd.f32 %v3356_v13, %v1790_v22  ;;  %v1805_v15 = vadd.f32 %v2709_v39, %v3271_v38  ;;  %v1798_v3 = vadd.f32 %v2707_v47, %v1797_v48 }
 0x178   : > { %v2713_v40 = vpop.eup %2712  ;;  %v1829_v46 = vmul.f32 0.25, %v1789_v43 }
 0x179   : > { %v2715_v6 = vpop.eup %2714  ;;  %v1792_v24 = vadd.f32 %v2711_v63, %v1791_v35  ;;  %v1799_v28 = vadd.f32 %v2713_v40, %v3357_v25  ;;  %v1832_v44 = vmul.f32 0.25, %v1798_v3  ;;  %v1806_v49 = vadd.f32 %v3289_v53, %v1805_v15 }
 0x17a   : > { %v2717_v16 = vpop.eup %2716 }
 0x17b   : > { %v2719_v17 = vpop.eup %2718  ;;  %v1830_v60 = vmul.f32 0.25, %v1792_v24  ;;  %v1800_v2 = vadd.f32 %v3358_v12, %v1799_v28  ;;  %v2251_v7 = vpack.c.bf16 %v1832_v44, %v1831_v56  ;;  %v1807_v26 = vadd.f32 %v2717_v16, %v1806_v49 }
 0x17c   : > { %v1808_v38 = vadd.f32 %v2719_v17, %v2715_v6  ;;  %v2721_v23 = vpop.eup %2720 }
 0x17d   : > { %v2246_v36 = vpack.c.bf16 %v1830_v60, %v1829_v46  ;;  %v2723_v32 = vpop.eup %2722  ;;  %2272 = vst [vmem:[%s3234_s14 + $0x50] sm:$0xff] %v2251_v7   ;;  %v1835_v42 = vmul.f32 0.25, %v1807_v26 }
 0x17e   : > { %v1809_v1 = vadd.f32 %v2721_v23, %v1808_v38 }
 0x17f   : > { %v2725_v50 = vpop.eup %2724  ;;  %2271 = vst [vmem:[%s3234_s14 + $0x48] sm:$0xff] %v2246_v36  }
 0x180   : > { %v1810_v37 = vadd.f32 %v2723_v32, %v1809_v1  ;;  %v1802_v53 = vadd.f32 %v2725_v50, %v3359_v18 }
 0x181   : > { %v2727_v21 = vpop.eup %2726 }
 0x182   : > { %v1801_v45 = vadd.f32 %v2727_v21, %v1800_v2  ;;  %v1836_v11 = vmul.f32 0.25, %v1810_v37  ;;  %v1803_v51 = vadd.f32 %v3360_v0, %v1802_v53  ;;  %v2729_v14 = vpop.eup %2728 }
 0x184   : > { %v2261_v30 = vpack.c.bf16 %v1836_v11, %v1835_v42  ;;  %v1804_v27 = vadd.f32 %v2729_v14, %v1803_v51  ;;  %v1833_v10 = vmul.f32 0.25, %v1801_v45 }
 0x186   : > { %2274 = vst [vmem:[%s3234_s14 + $0x60] sm:$0xff] %v2261_v30   ;;  %v1834_v54 = vmul.f32 0.25, %v1804_v27 }
 0x188   : > { %v2256_v55 = vpack.c.bf16 %v1834_v54, %v1833_v10 }
 0x18a   : > { %2273 = vst [vmem:[%s3234_s14 + $0x58] sm:$0xff] %v2256_v55  }
 0x18b PF: > { %p10_p9 = scmp.ge.s32.totalorder %s2792_s16, 4   ;;  %s3361_s12 = smov %s2748_s13 }
 0x18c   : > { %s3362_s13 = smov %s2801_s19  ;;  %s3363_s14 = smov %s2792_s16 }
 0x18d   :  { %12 = sbr.rel (!%p10_p9) target bundleno = 2 (0x2), region = 108 }

// kernel: lenet5_forward.4
= control target key start
LH: loop header
LB: loop body
LE: loop exit
PB: predicated region body
PF: predicated region fallthrough
CT: control target
= control target key end

     0   :  { %s908_s12 = smov 0   ;;  %s910_s13 = smov 0   ;;  %s1037_s0 = inlined_call_operand.vmem [shape: bf16[4,64,150], index: 0, kind: input, shape index: {}]   ;;  %s1038_s1 = inlined_call_operand.vmem [shape: bf16[150,128], index: 1, kind: input, shape index: {}]   ;;  %s1039_s2 = inlined_call_operand.vmem [shape: f32[1,128], index: 2, kind: input, shape index: {}]   ;;  %s1040_s3 = inlined_call_operand.vmem [shape: bf16[64,128], index: 3, kind: output, shape index: {}]  }
   0x1   :  { %s912_s14 = smov 0  }
   0x2 LB: > { %s682_s15 = sadd.s32 4294967295, %s885_s14   ;;  %s925_s16 = sadd.s32 1, %s885_s14   ;;  %s885_s14 = sphi %s912_s14, %s1043_s14   ;;  %s881_s13 = sphi %s910_s13, %s1042_s13   ;;  %s877_s12 = sphi %s908_s12, %s1041_s12  }
   0x3   : > { %s17_s17 = ssub.s32 %s885_s14, %s925_s16  ;;  %s20_s18 = sadd.s32 1, %s881_s13 }
   0x4   : > { %p18_p0 = scmp.eq.s32.totalorder %s17_s17, 0  ;;  %p27_p1 = scmp.ne.s32.totalorder %s881_s13, %s877_s12 }
   0x5   : > { %p28_p2 = scmp.eq.s32.totalorder %s885_s14, 0  ;;  %p685_p4 = scmp.ge.s32.totalorder %s885_s14, 2 }
   0x6   : > { %s934_s19 = scalar_select %p18_p0, %s881_s13, %s20_s18  }
   0x7   : > { %p29_p3 = por %p28_p2, %p27_p1  ;;  %127 = sbr.rel (%p685_p4) target bundleno = 24 (0x18), region = 24 }
   0xc   : > { %130 = sbr.rel (!%p29_p3) target bundleno = 24 (0x18), region = 28  ;;  %s132_s20 = sand.u32 (%p29_p3), 1, %s881_s13  }
   0xd   : > { %s736_s21 = sshll.u32 (%p29_p3), %s885_s14, 5  ;;  %s686_s22 = sshll.u32 (%p29_p3), %s132_s20, 7 }
   0xe   : > { %s942_s25 = scalar_lea.vmem (%p29_p3), %s1037_s0, %s736_s21  ;;  %s134_s26 = scalar_lea.vmem (%p29_p3), [#allocation2], %s686_s22 }
   0xf   : > { %v197_v0 = vld [vmem:[%s942_s25] sm:$0xff] (%p29_p3)  ;;  %v199_v1 = vld [vmem:[%s942_s25 + $0x8] sm:$0xff] (%p29_p3)  ;;  %v201_v2 = vld [vmem:[%s942_s25 + $0x10] sm:$0xff] (%p29_p3) }
  0x10   : > { %198 = vst [vmem:[%s134_s26] sm:$0xff] (%p29_p3), %v197_v0  ;;  %200 = vst [vmem:[%s134_s26 + $0x8] sm:$0xff] (%p29_p3), %v199_v1  ;;  %v203_v3 = vld [vmem:[%s942_s25 + $0x18] sm:$0xff] (%p29_p3)  ;;  %v205_v4 = vld [vmem:[%s942_s25 + $0x40] sm:$0xff] (%p29_p3) }
  0x11   : > { %202 = vst [vmem:[%s134_s26 + $0x10] sm:$0xff] %v201_v2  ;;  %v207_v5 = vld [vmem:[%s942_s25 + $0x48] sm:$0xff]  ;;  %204 = vst [vmem:[%s134_s26 + $0x18] sm:$0xff] %v203_v3  ;;  %v209_v6 = vld [vmem:[%s942_s25 + $0x50] sm:$0xff] }
  0x12   : > { %206 = vst [vmem:[%s134_s26 + $0x20] sm:$0xff] %v205_v4  ;;  %208 = vst [vmem:[%s134_s26 + $0x28] sm:$0xff] %v207_v5  ;;  %v211_v7 = vld [vmem:[%s942_s25 + $0x58] sm:$0xff]  ;;  %v213_v8 = vld [vmem:[%s942_s25 + $0x80] sm:$0xff] }
  0x13   : > { %210 = vst [vmem:[%s134_s26 + $0x30] sm:$0xff] %v209_v6  ;;  %212 = vst [vmem:[%s134_s26 + $0x38] sm:$0xff] %v211_v7  ;;  %v215_v9 = vld [vmem:[%s942_s25 + $0x88] sm:$0xff]  ;;  %v217_v10 = vld [vmem:[%s942_s25 + $0x90] sm:$0xff] }
  0x14   : > { %214 = vst [vmem:[%s134_s26 + $0x40] sm:$0xff] %v213_v8  ;;  %v219_v11 = vld [vmem:[%s942_s25 + $0x98] sm:$0xff]  ;;  %216 = vst [vmem:[%s134_s26 + $0x48] sm:$0xff] %v215_v9  ;;  %v221_v12 = vld [vmem:[%s942_s25 + $0xc0] sm:$0xff] }
  0x15   : > { %218 = vst [vmem:[%s134_s26 + $0x50] sm:$0xff] %v217_v10  ;;  %220 = vst [vmem:[%s134_s26 + $0x58] sm:$0xff] %v219_v11  ;;  %v223_v13 = vld [vmem:[%s942_s25 + $0xc8] sm:$0xff]  ;;  %v225_v14 = vld [vmem:[%s942_s25 + $0xd0] sm:$0xff] }
  0x16   : > { %222 = vst [vmem:[%s134_s26 + $0x60] sm:$0xff] %v221_v12  ;;  %224 = vst [vmem:[%s134_s26 + $0x68] sm:$0xff] %v223_v13  ;;  %v227_v15 = vld [vmem:[%s942_s25 + $0xd8] sm:$0xff] }
  0x17   : > { %226 = vst [vmem:[%s134_s26 + $0x70] sm:$0xff] %v225_v14  ;;  %228 = vst [vmem:[%s134_s26 + $0x78] sm:$0xff] %v227_v15 }
  0x18 PF: > { %p690_p5 = scmp.ge.s32.totalorder %s885_s14, 1  ;;  %p233_p6 = scmp.lt.s32.totalorder %s885_s14, 3 }
  0x1a   : > { %p234_p7 = pnand %p690_p5, %p233_p6 }
  0x1b   : > { %s240_s4 = sand.u32 (!%p234_p7), 1, %s877_s12   ;;  %s692_s30 = sshll.u32 (!%p234_p7), %s682_s15, 2 }
  0x1c   : > { %237 = sbr.rel (%p234_p7) target bundleno = 322 (0x142), region = 66  ;;  %s691_s5 = sshll.u32 (!%p234_p7), %s240_s4, 7 }
  0x1d   : > { %s972_s8 = scalar_lea.vmem (!%p234_p7), [#allocation2], %s691_s5  ;;  %p265_p8 = scmp.lt.s32.totalorder (!%p234_p7), %s692_s30, 7 }
  0x21   : > { %v797_v16 = vld [vmem:[%s1038_s1 + $0x38] sm:$0xff]   ;;  %v887_v17 = vmov 0   ;;  %v798_v18 = vld [vmem:[%s1038_s1 + $0x30] sm:$0xff]   ;;  %v799_v19 = vld [vmem:[%s1038_s1 + $0x28] sm:$0xff]   ;;  %vm442_vm0 = vcmask 179200   ;;  %vm467_vm1 = vcmask 1042432  }
  0x22   : > { %471 = vmatprep.subr.bf16.mxu0 %v887_v17  ;;  %752 = vmatprep.subr.bf16.mxu1 %v887_v17  ;;  %v800_v20 = vld [vmem:[%s1038_s1 + $0x20] sm:$0xff]   ;;  %v801_v23 = vld [vmem:[%s1038_s1 + $0x18] sm:$0xff]   ;;  %v802_v24 = vld [vmem:[%s1038_s1 + $0x10] sm:$0xff]   ;;  %s1045_s30 = smov (!%p265_p8, %s692_s30), 7 }
  0x23   : > { %472 = vmatpush1.bf16.msra.mxu0 %v797_v16  ;;  %762 = vmatpush1.bf16.msra.mxu1 %v797_v16  ;;  %v809_v21 = vld [vmem:[%s972_s8 + $0x4] ss:$8 sps:$4 sm:$0xff]   ;;  %v805_v27 = vld [vmem:[%s1038_s1 + $0x48] ss:$0 sps:$4 sm:$0x77]   ;;  %s693_s14 = sshll.u32 %s1045_s30, 2 }
  0x24   : > { %473 = vmatprep.subr.bf16.mxu0 %v887_v17  ;;  %753 = vmatprep.subr.bf16.mxu1 %v887_v17  ;;  %v812_v22 = vld [vmem:[%s972_s8 + $0x44] ss:$8 sps:$4 sm:$0xff]   ;;  %v469_v28 = vsel %vm467_vm1, %v805_v27, 0  ;;  %v807_v30 = vld [vmem:[%s972_s8] ss:$8 sps:$4 sm:$0xff]   ;;  %s268_s5 = scalar_lea.vmem %s1040_s3, %s693_s14 }
  0x25   : > { %721 = vmatprep.mubr.msk.bf16.mxu0 %vm442_vm0, %v809_v21  ;;  %725 = vmatprep.mubr.msk.bf16.mxu1 %vm442_vm0, %v812_v22  ;;  %v803_v25 = vld [vmem:[%s1038_s1 + $0x8] sm:$0xff]   ;;  %v804_v26 = vld [vmem:[%s1038_s1] sm:$0xff]   ;;  %v813_v32 = vld [vmem:[%s972_s8 + $0x14] ss:$8 sps:$4 sm:$0xff]  }
  0x26   : > { %v806_v29 = vld [vmem:[%s1038_s1 + $0x40] sm:$0xff]   ;;  %v815_v33 = vld [vmem:[%s972_s8 + $0x54] ss:$8 sps:$4 sm:$0xff]   ;;  %v817_v34 = vld [vmem:[%s972_s8 + $0x10] ss:$8 sps:$4 sm:$0xff]  }
  0x27   : > { %474 = vmatpush1.bf16.msra.mxu0 %v798_v18  ;;  %763 = vmatpush1.bf16.msra.mxu1 %v798_v18  ;;  %v810_v31 = vld [vmem:[%s972_s8 + $0x40] ss:$8 sps:$4 sm:$0xff]   ;;  %v818_v35 = vld [vmem:[%s972_s8 + $0x50] ss:$8 sps:$4 sm:$0xff]   ;;  %v819_v36 = vld [vmem:[%s972_s8 + $0x24] ss:$8 sps:$4 sm:$0xff]  }
  0x28   : > { %475 = vmatprep.subr.bf16.mxu0 %v887_v17  ;;  %754 = vmatprep.subr.bf16.mxu1 %v887_v17  ;;  %v821_v37 = vld [vmem:[%s972_s8 + $0x64] ss:$8 sps:$4 sm:$0xff]   ;;  %v823_v38 = vld [vmem:[%s972_s8 + $0x20] ss:$8 sps:$4 sm:$0xff]   ;;  %v825_v40 = vld [vmem:[%s972_s8 + $0x34] ss:$8 sps:$4 sm:$0xff]  }
  0x29   : > { %v824_v39 = vld [vmem:[%s972_s8 + $0x60] ss:$8 sps:$4 sm:$0xff]   ;;  %v827_v41 = vld [vmem:[%s972_s8 + $0x74] ss:$8 sps:$4 sm:$0xff]   ;;  %v829_v42 = vld [vmem:[%s972_s8 + $0x30] ss:$8 sps:$4 sm:$0xff]  }
  0x2a   : > { %v830_v43 = vld [vmem:[%s972_s8 + $0x70] ss:$8 sps:$4 sm:$0xff]   ;;  %v694_v56 = vld [vmem:[%s1039_s2] ss:$0 sm:$0xff] }
  0x2b   : > { %476 = vmatpush1.bf16.msra.mxu0 %v799_v19  ;;  %764 = vmatpush1.bf16.msra.mxu1 %v799_v19 }
  0x2c   : > { %477 = vmatprep.subr.bf16.mxu0 %v887_v17  ;;  %755 = vmatprep.subr.bf16.mxu1 %v887_v17 }
  0x2f   : > { %478 = vmatpush1.bf16.msra.mxu0 %v800_v20  ;;  %765 = vmatpush1.bf16.msra.mxu1 %v800_v20 }
  0x30   : > { %479 = vmatprep.subr.bf16.mxu0 %v887_v17  ;;  %756 = vmatprep.subr.bf16.mxu1 %v887_v17 }
  0x33   : > { %480 = vmatpush1.bf16.msra.mxu0 %v801_v23  ;;  %766 = vmatpush1.bf16.msra.mxu1 %v801_v23 }
  0x34   : > { %481 = vmatprep.subr.bf16.mxu0 %v887_v17  ;;  %757 = vmatprep.subr.bf16.mxu1 %v887_v17 }
  0x37   : > { %482 = vmatpush1.bf16.msra.mxu0 %v802_v24  ;;  %767 = vmatpush1.bf16.msra.mxu1 %v802_v24 }
  0x38   : > { %483 = vmatprep.subr.bf16.mxu0 %v887_v17  ;;  %758 = vmatprep.subr.bf16.mxu1 %v887_v17 }
  0x3b   : > { %484 = vmatpush1.bf16.msra.mxu0 %v803_v25  ;;  %768 = vmatpush1.bf16.msra.mxu1 %v803_v25 }
  0x3c   : > { %485 = vmatprep.subr.bf16.mxu0 %v887_v17  ;;  %759 = vmatprep.subr.bf16.mxu1 %v887_v17 }
  0x3f   : > { %486 = vmatpush1.bf16.msra.mxu0 %v804_v26  ;;  %769 = vmatpush1.bf16.msra.mxu1 %v804_v26 }
  0x40   : > { %499 = vmatprep.subr.bf16.mxu0 %v887_v17  ;;  %760 = vmatprep.subr.bf16.mxu1 %v887_v17 }
  0x43   : > { %500 = vmatpush2.bf16.msra.mxu0 %v469_v28  ;;  %770 = vmatpush2.bf16.msra.mxu1 %v469_v28 }
  0x44   : > { %501 = vmatprep.subr.bf16.mxu0 %v887_v17  ;;  %761 = vmatprep.subr.bf16.mxu1 %v887_v17 }
  0x47   : > { %502 = vmatpush2.bf16.msra.mxu0 %v806_v29  ;;  %771 = vmatpush2.bf16.msra.mxu1 %v806_v29 }
  0x4a   : > { %504 = vmatmul.mubr.bf16.vlgmr.msra.gmra.mxu0 %v807_v30  ;;  %536 = vmatmul.mubr.bf16.vlgmr.msra.gmra.mxu1 %v810_v31 }
  0x4b   : > { %722 = vmatprep.mubr.msk.bf16.mxu0 %vm442_vm0, %v813_v32  ;;  %726 = vmatprep.mubr.msk.bf16.mxu1 %vm442_vm0, %v815_v33 }
  0x52   : > { %512 = vmatmul.mubr.bf16.gmra.mxu0 %v817_v34  ;;  %544 = vmatmul.mubr.bf16.gmra.mxu1 %v818_v35 }
  0x53   : > { %723 = vmatprep.mubr.msk.bf16.mxu0 %vm442_vm0, %v819_v36  ;;  %727 = vmatprep.mubr.msk.bf16.mxu1 %vm442_vm0, %v821_v37 }
  0x5a   : > { %520 = vmatmul.mubr.bf16.gmra.mxu0 %v823_v38  ;;  %552 = vmatmul.mubr.bf16.gmra.mxu1 %v824_v39 }
  0x5b   : > { %724 = vmatprep.mubr.msk.bf16.mxu0 %vm442_vm0, %v825_v40  ;;  %728 = vmatprep.mubr.msk.bf16.mxu1 %vm442_vm0, %v827_v41 }
  0x62   : > { %528 = vmatmul.mubr.bf16.gmra.mxu0 %v829_v42  ;;  %560 = vmatmul.mubr.bf16.gmra.mxu1 %v830_v43 }
 0x10a   : > { %v505_v44 = vpop.f32.mrf.mxu0  ;;  %v537_v45 = vpop.f32.mrf.mxu1 }
 0x10b   : > { %v506_v59 = vadd.f32 %v694_v56, %v505_v44  ;;  %v538_v62 = vadd.f32 %v694_v56, %v537_v45 }
 0x10c   : > { %v507_v46 = vpop.f32.mrf.mxu0  ;;  %v539_v47 = vpop.f32.mrf.mxu1 }
 0x10d   : > { %831 = vtanh.f32 %v506_v59 }
 0x10e   : > { %v508_v48 = vpop.f32.mrf.mxu0  ;;  %v540_v49 = vpop.f32.mrf.mxu1 }
 0x10f   : > { %v509_v1 = vadd.f32 %v694_v56, %v508_v48  ;;  %v541_v6 = vadd.f32 %v694_v56, %v540_v49 }
 0x110   : > { %v510_v50 = vpop.f32.mrf.mxu0  ;;  %v542_v51 = vpop.f32.mrf.mxu1 }
 0x112   : > { %v513_v52 = vpop.f32.mrf.mxu0  ;;  %v545_v53 = vpop.f32.mrf.mxu1 }
 0x113   : > { %v514_v9 = vadd.f32 %v694_v56, %v513_v52  ;;  %v546_v14 = vadd.f32 %v694_v56, %v545_v53 }
 0x114   : > { %v515_v54 = vpop.f32.mrf.mxu0  ;;  %v547_v55 = vpop.f32.mrf.mxu1 }
 0x116   : > { %v516_v57 = vpop.f32.mrf.mxu0  ;;  %v548_v58 = vpop.f32.mrf.mxu1 }
 0x117   : > { %v517_v17 = vadd.f32 %v694_v56, %v516_v57  ;;  %v549_v24 = vadd.f32 %v694_v56, %v548_v58 }
 0x118   : > { %v518_v60 = vpop.f32.mrf.mxu0  ;;  %v550_v61 = vpop.f32.mrf.mxu1 }
 0x11a   : > { %v521_v63 = vpop.f32.mrf.mxu0  ;;  %v553_v0 = vpop.f32.mrf.mxu1 }
 0x11b   : > { %v522_v2 = vadd.f32 %v694_v56, %v521_v63  ;;  %v554_v3 = vadd.f32 %v694_v56, %v553_v0  ;;  %v832_v28 = vpop.eup %831 }
 0x11c   : > { %v523_v4 = vpop.f32.mrf.mxu0  ;;  %v555_v5 = vpop.f32.mrf.mxu1 }
 0x11d   : > { %833 = vtanh.f32 %v522_v2 }
 0x11e   : > { %835 = vtanh.f32 %v538_v62  ;;  %v524_v7 = vpop.f32.mrf.mxu0  ;;  %v556_v8 = vpop.f32.mrf.mxu1 }
 0x11f   : > { %837 = vtanh.f32 %v509_v1  ;;  %v525_v10 = vadd.f32 %v694_v56, %v524_v7  ;;  %v557_v11 = vadd.f32 %v694_v56, %v556_v8 }
 0x120   : > { %839 = vtanh.f32 %v554_v3  ;;  %v526_v12 = vpop.f32.mrf.mxu0  ;;  %v558_v13 = vpop.f32.mrf.mxu1 }
 0x121   : > { %841 = vtanh.f32 %v525_v10 }
 0x122   : > { %843 = vtanh.f32 %v541_v6  ;;  %v529_v15 = vpop.f32.mrf.mxu0  ;;  %v561_v16 = vpop.f32.mrf.mxu1 }
 0x123   : > { %845 = vtanh.f32 %v514_v9  ;;  %v530_v18 = vadd.f32 %v694_v56, %v529_v15  ;;  %v562_v19 = vadd.f32 %v694_v56, %v561_v16 }
 0x124   : > { %847 = vtanh.f32 %v557_v11  ;;  %v531_v20 = vpop.f32.mrf.mxu0  ;;  %v563_v21 = vpop.f32.mrf.mxu1 }
 0x125   : > { %849 = vtanh.f32 %v530_v18 }
 0x126   : > { %851 = vtanh.f32 %v546_v14  ;;  %v532_v22 = vpop.f32.mrf.mxu0  ;;  %v564_v23 = vpop.f32.mrf.mxu1 }
 0x127   : > { %853 = vtanh.f32 %v517_v17  ;;  %v533_v25 = vadd.f32 %v694_v56, %v532_v22  ;;  %v565_v29 = vadd.f32 %v694_v56, %v564_v23 }
 0x128   : > { %855 = vtanh.f32 %v562_v19  ;;  %v534_v26 = vpop.f32.mrf.mxu0  ;;  %v566_v27 = vpop.f32.mrf.mxu1 }
 0x129   : > { %857 = vtanh.f32 %v533_v25 }
 0x12a   : > { %v834_v30 = vpop.eup %833  ;;  %859 = vtanh.f32 %v549_v24 }
 0x12b   : > { %v836_v31 = vpop.eup %835  ;;  %v584_v32 = vadd.f32 %v834_v30, %v832_v28  ;;  %861 = vtanh.f32 %v565_v29 }
 0x12c   : > { %v838_v33 = vpop.eup %837 }
 0x12d   : > { %v840_v34 = vpop.eup %839  ;;  %v585_v35 = vadd.f32 %v836_v31, %v584_v32 }
 0x12e   : > { %v842_v36 = vpop.eup %841 }
 0x12f   : > { %v844_v37 = vpop.eup %843  ;;  %v587_v38 = vadd.f32 %v842_v36, %v838_v33  ;;  %v586_v41 = vadd.f32 %v840_v34, %v585_v35 }
 0x130   : > { %v846_v39 = vpop.eup %845 }
 0x131   : > { %v848_v40 = vpop.eup %847  ;;  %v588_v42 = vadd.f32 %v844_v37, %v587_v38  ;;  %v596_v49 = vmul.f32 0.25, %v586_v41 }
 0x132   : > { %v850_v43 = vpop.eup %849 }
 0x133   : > { %v852_v44 = vpop.eup %851  ;;  %v589_v45 = vadd.f32 %v848_v40, %v588_v42  ;;  %v590_v46 = vadd.f32 %v850_v43, %v846_v39 }
 0x134   : > { %v854_v47 = vpop.eup %853 }
 0x135   : > { %v856_v48 = vpop.eup %855  ;;  %v597_v50 = vmul.f32 0.25, %v589_v45  ;;  %v591_v51 = vadd.f32 %v852_v44, %v590_v46 }
 0x136   : > { %v858_v52 = vpop.eup %857 }
 0x137   : > { %v744_v53 = vpack.c.bf16 %v597_v50, %v596_v49  ;;  %v593_v54 = vadd.f32 %v858_v52, %v854_v47  ;;  %v860_v55 = vpop.eup %859  ;;  %v592_v56 = vadd.f32 %v856_v48, %v591_v51 }
 0x138   : > { %v862_v58 = vpop.eup %861 }
 0x139   : > { %745 = vst [vmem:[%s268_s5] sm:$0xff] %v744_v53   ;;  %v594_v57 = vadd.f32 %v860_v55, %v593_v54  ;;  %v598_v60 = vmul.f32 0.25, %v592_v56 }
 0x13b   : > { %v595_v59 = vadd.f32 %v862_v58, %v594_v57 }
 0x13d   : > { %v599_v61 = vmul.f32 0.25, %v595_v59 }
 0x13f   : > { %v749_v62 = vpack.c.bf16 %v599_v61, %v598_v60 }
 0x141   : > { %751 = vst [vmem:[%s268_s5 + $0x8] sm:$0xff] %v749_v62  }
 0x142 PF: > { %p10_p9 = scmp.ge.s32.totalorder %s925_s16, 4   ;;  %s1041_s12 = smov %s881_s13 }
 0x143   : > { %s1042_s13 = smov %s934_s19  ;;  %s1043_s14 = smov %s925_s16 }
 0x144   :  { %12 = sbr.rel (!%p10_p9) target bundleno = 2 (0x2), region = 105 }

// kernel: lenet5_forward.5
= control target key start
LH: loop header
LB: loop body
LE: loop exit
PB: predicated region body
PF: predicated region fallthrough
CT: control target
= control target key end

     0   :  { %v766_v0 = vmov 0   ;;  %vm257_vm0 = vcmask 130048   ;;  %v767_v30 = vmov 0.0   ;;  %vm768_vm1 = vmmov 0   ;;  %s986_s1 = inlined_call_operand.vmem [shape: bf16[400,128], index: 1, kind: input, shape index: {}]   ;;  %s987_s0 = inlined_call_operand.vmem [shape: bf16[16,400], index: 0, kind: input, shape index: {}]   ;;  %s988_s3 = inlined_call_operand.vmem [shape: bf16[128,128], index: 3, kind: input, shape index: {}]   ;;  %s989_s5 = inlined_call_operand.vmem [shape: bf16[128,128], index: 5, kind: input, shape index: {}]   ;;  %s990_s2 = inlined_call_operand.vmem [shape: f32[1,128], index: 2, kind: input, shape index: {}]   ;;  %s991_s4 = inlined_call_operand.vmem [shape: f32[1,128], index: 4, kind: input, shape index: {}]   ;;  %s992_s6 = inlined_call_operand.vmem [shape: f32[1,128], index: 6, kind: input, shape index: {}]   ;;  %s993_s7 = inlined_call_operand.vmem [shape: f32[16,128], index: 7, kind: output, shape index: {}]  }
   0x1   :  { %302 = vmatprep.subr.bf16.mxu1 %v766_v0  ;;  %v711_v1 = vld [vmem:[%s986_s1 + $0x78] sm:$0xff]   ;;  %v714_v4 = vld [vmem:[%s986_s1 + $0x70] sm:$0xff]   ;;  %v717_v7 = vld [vmem:[%s986_s1 + $0x68] sm:$0xff]  }
   0x2   :  { %v712_v2 = vld [vmem:[%s986_s1 + $0xb8] sm:$0xff]   ;;  %628 = vmatprep.subr.bf16.mxu0 %v711_v1  ;;  %v715_v5 = vld [vmem:[%s986_s1 + $0xb0] sm:$0xff]   ;;  %v718_v8 = vld [vmem:[%s986_s1 + $0xa8] sm:$0xff]  }
   0x3   :  { %v713_v3 = vld [vmem:[%s986_s1 + $0x38] sm:$0xff]   ;;  %303 = vmatpush1.bf16.msra.mxu1 %v712_v2  ;;  %v716_v6 = vld [vmem:[%s986_s1 + $0x30] sm:$0xff]   ;;  %v719_v9 = vld [vmem:[%s986_s1 + $0x28] sm:$0xff]  }
   0x4   :  { %629 = vmatpush3.bf16.msra.mxu0 %v713_v3  ;;  %304 = vmatprep.subr.bf16.mxu1 %v766_v0  ;;  %v720_v10 = vld [vmem:[%s986_s1 + $0x60] sm:$0xff]   ;;  %v723_v13 = vld [vmem:[%s986_s1 + $0x58] sm:$0xff]   ;;  %v726_v16 = vld [vmem:[%s986_s1 + $0x50] sm:$0xff]  }
   0x5   :  { %630 = vmatprep.subr.bf16.mxu0 %v714_v4  ;;  %v721_v11 = vld [vmem:[%s986_s1 + $0xa0] sm:$0xff]   ;;  %v724_v14 = vld [vmem:[%s986_s1 + $0x98] sm:$0xff]   ;;  %v727_v17 = vld [vmem:[%s986_s1 + $0x90] sm:$0xff]  }
   0x6   :  { %v722_v12 = vld [vmem:[%s986_s1 + $0x20] sm:$0xff]   ;;  %v725_v15 = vld [vmem:[%s986_s1 + $0x18] sm:$0xff]   ;;  %v728_v18 = vld [vmem:[%s986_s1 + $0x10] sm:$0xff]  }
   0x7   :  { %305 = vmatpush1.bf16.msra.mxu1 %v715_v5  ;;  %v729_v19 = vld [vmem:[%s986_s1 + $0x48] sm:$0xff]   ;;  %v732_v22 = vld [vmem:[%s986_s1 + $0x40] sm:$0xff]   ;;  %v742_v29 = vld [vmem:[%s988_s3 + $0x38] sm:$0xff]  }
   0x8   :  { %631 = vmatpush3.bf16.msra.mxu0 %v716_v6  ;;  %306 = vmatprep.subr.bf16.mxu1 %v766_v0  ;;  %v730_v20 = vld [vmem:[%s986_s1 + $0x88] sm:$0xff]   ;;  %v737_v23 = vld [vmem:[%s987_s0 + $0x4] ss:$16 sps:$4 sm:$0xff]   ;;  %v735_v27 = vld [vmem:[%s987_s0] ss:$16 sps:$4 sm:$0xff]  }
   0x9   :  { %632 = vmatprep.subr.bf16.mxu0 %v717_v7  ;;  %v731_v21 = vld [vmem:[%s986_s1 + $0x8] sm:$0xff]   ;;  %v733_v24 = vld [vmem:[%s986_s1 + $0x80] sm:$0xff]   ;;  %293 = vmatprep.mubr.bf16.mxu0 %v737_v23  ;;  %v743_v32 = vld [vmem:[%s988_s3 + $0x30] sm:$0xff]  }
   0xa   :  { %v741_v25 = vld [vmem:[%s987_s0 + $0xc] ss:$16 sps:$4 sm:$0xff]   ;;  %v734_v26 = vld [vmem:[%s986_s1] sm:$0xff]   ;;  %v739_v31 = vld [vmem:[%s987_s0 + $0x8] ss:$16 sps:$4 sm:$0xff]  }
   0xb   :  { %307 = vmatpush1.bf16.msra.mxu1 %v718_v8  ;;  %v738_v28 = vld [vmem:[%s986_s1 + $0xc0] sm:$0xff]   ;;  %609 = vmatprep.mubr.msk.bf16.mxu1 %vm257_vm0, %v741_v25  ;;  %v744_v33 = vld [vmem:[%s988_s3 + $0x28] sm:$0xff]   ;;  %v746_v35 = vld [vmem:[%s988_s3 + $0x18] sm:$0xff]  }
   0xc   :  { %633 = vmatpush3.bf16.msra.mxu0 %v719_v9  ;;  %308 = vmatprep.subr.bf16.mxu1 %v766_v0  ;;  %v745_v34 = vld [vmem:[%s988_s3 + $0x20] sm:$0xff]   ;;  %v747_v36 = vld [vmem:[%s988_s3 + $0x10] sm:$0xff]   ;;  %v748_v37 = vld [vmem:[%s988_s3 + $0x8] sm:$0xff]  }
   0xd   :  { %634 = vmatprep.subr.bf16.mxu0 %v720_v10  ;;  %v749_v38 = vld [vmem:[%s988_s3] sm:$0xff]   ;;  %v750_v39 = vld [vmem:[%s989_s5 + $0x38] sm:$0xff]   ;;  %v751_v40 = vld [vmem:[%s989_s5 + $0x30] sm:$0xff]  }
   0xe   :  { %v579_v43 = vld [vmem:[%s990_s2] ss:$0 sm:$0xff]  ;;  %v752_v59 = vld [vmem:[%s989_s5 + $0x28] sm:$0xff]   ;;  %v754_v61 = vld [vmem:[%s989_s5 + $0x18] sm:$0xff]  }
   0xf   :  { %309 = vmatpush1.bf16.msra.mxu1 %v721_v11  ;;  %v753_v60 = vld [vmem:[%s989_s5 + $0x20] sm:$0xff]   ;;  %v755_v62 = vld [vmem:[%s989_s5 + $0x10] sm:$0xff]   ;;  %v756_v63 = vld [vmem:[%s989_s5 + $0x8] sm:$0xff]  }
  0x10   :  { %635 = vmatpush3.bf16.msra.mxu0 %v722_v12  ;;  %310 = vmatprep.subr.bf16.mxu1 %v766_v0  ;;  %v610_v1 = vld [vmem:[%s991_s4] ss:$0 sm:$0xff] }
  0x11   :  { %636 = vmatprep.subr.bf16.mxu0 %v723_v13  ;;  %v619_v11 = vld [vmem:[%s992_s6] ss:$0 sm:$0xff] }
  0x13   :  { %311 = vmatpush1.bf16.msra.mxu1 %v724_v14 }
  0x14   :  { %637 = vmatpush3.bf16.msra.mxu0 %v725_v15  ;;  %312 = vmatprep.subr.bf16.mxu1 %v766_v0 }
  0x15   :  { %638 = vmatprep.subr.bf16.mxu0 %v726_v16 }
  0x17   :  { %313 = vmatpush1.bf16.msra.mxu1 %v727_v17 }
  0x18   :  { %639 = vmatpush3.bf16.msra.mxu0 %v728_v18  ;;  %314 = vmatprep.subr.bf16.mxu1 %v766_v0 }
  0x19   :  { %640 = vmatprep.subr.bf16.mxu0 %v729_v19 }
  0x1b   :  { %315 = vmatpush1.bf16.msra.mxu1 %v730_v20 }
  0x1c   :  { %641 = vmatpush3.bf16.msra.mxu0 %v731_v21  ;;  %316 = vmatprep.subr.bf16.mxu1 %v766_v0 }
  0x1d   :  { %642 = vmatprep.subr.bf16.mxu0 %v732_v22 }
  0x1f   :  { %317 = vmatpush1.bf16.msra.mxu1 %v733_v24 }
  0x20   :  { %643 = vmatpush3.bf16.msra.mxu0 %v734_v26  ;;  %332 = vmatprep.subr.bf16.mxu1 %v766_v0  ;;  %v757_v0 = vld [vmem:[%s989_s5] sm:$0xff]  }
  0x21   :  { %668 = vmatprep.subr.bf16.mxu0 %v767_v30 }
  0x23   :  { %294 = vmatmul.mubr.bf16.vlgmr.msra.gmra.mxu0 %v735_v27  ;;  %333 = vmatpush2.bf16.msra.mxu1 %v738_v28 }
  0x24   :  { %669 = vmatpush3.bf16.msra.mxu0 %v742_v29  ;;  %688 = vmatprep.subr.bf16.mxu1 %v767_v30 }
  0x25   :  { %670 = vmatprep.subr.bf16.mxu0 %v767_v30  ;;  %684 = vmatprep.mubr.msk.bf16.mxu0 %vm768_vm1, %v767_v30 }
  0x26   :  { %335 = vmatmul.mubr.bf16.vlgmr.msra.gmra.mxu1 %v739_v31 }
  0x27   :  { %704 = vmatprep.mubr.msk.bf16.mxu1 %vm768_vm1, %v767_v30  ;;  %689 = vmatpush3.bf16.msra.mxu1 %v750_v39 }
  0x28   :  { %671 = vmatpush3.bf16.msra.mxu0 %v743_v32  ;;  %690 = vmatprep.subr.bf16.mxu1 %v767_v30 }
  0x29   :  { %672 = vmatprep.subr.bf16.mxu0 %v767_v30 }
  0x2b   :  { %691 = vmatpush3.bf16.msra.mxu1 %v751_v40 }
  0x2c   :  { %673 = vmatpush3.bf16.msra.mxu0 %v744_v33  ;;  %692 = vmatprep.subr.bf16.mxu1 %v767_v30 }
  0x2d   :  { %674 = vmatprep.subr.bf16.mxu0 %v767_v30 }
  0x2f   :  { %693 = vmatpush3.bf16.msra.mxu1 %v752_v59 }
  0x30   :  { %675 = vmatpush3.bf16.msra.mxu0 %v745_v34  ;;  %694 = vmatprep.subr.bf16.mxu1 %v767_v30 }
  0x31   :  { %676 = vmatprep.subr.bf16.mxu0 %v767_v30 }
  0x33   :  { %695 = vmatpush3.bf16.msra.mxu1 %v753_v60 }
  0x34   :  { %677 = vmatpush3.bf16.msra.mxu0 %v746_v35  ;;  %696 = vmatprep.subr.bf16.mxu1 %v767_v30 }
  0x35   :  { %678 = vmatprep.subr.bf16.mxu0 %v767_v30 }
  0x37   :  { %697 = vmatpush3.bf16.msra.mxu1 %v754_v61 }
  0x38   :  { %679 = vmatpush3.bf16.msra.mxu0 %v747_v36  ;;  %698 = vmatprep.subr.bf16.mxu1 %v767_v30 }
  0x39   :  { %680 = vmatprep.subr.bf16.mxu0 %v767_v30 }
  0x3b   :  { %699 = vmatpush3.bf16.msra.mxu1 %v755_v62 }
  0x3c   :  { %681 = vmatpush3.bf16.msra.mxu0 %v748_v37  ;;  %700 = vmatprep.subr.bf16.mxu1 %v767_v30 }
  0x3d   :  { %682 = vmatprep.subr.bf16.mxu0 %v767_v30 }
  0x3f   :  { %701 = vmatpush3.bf16.msra.mxu1 %v756_v63 }
  0x40   :  { %683 = vmatpush3.bf16.msra.mxu0 %v749_v38  ;;  %702 = vmatprep.subr.bf16.mxu1 %v767_v30 }
  0x43   :  { %703 = vmatpush3.bf16.msra.mxu1 %v757_v0 }
  0xe3   :  { %v644_v41 = vpop.f32.mrf.mxu0 }
  0xe5   :  { %v645_v42 = vpop.f32.mrf.mxu0 }
  0xe6   :  { %v646_v44 = vadd.f32 %v645_v42, %v644_v41  ;;  %v336_v45 = vpop.f32.mrf.mxu1 }
  0xe7   :  { %v647_v46 = vpop.f32.mrf.mxu0 }
  0xe8   :  { %v296_v47 = vadd.f32 %v646_v44, %v579_v43  ;;  %v338_v48 = vpop.f32.mrf.mxu1 }
  0xe9   :  { %v648_v49 = vpop.f32.mrf.mxu0 }
  0xea   :  { %v649_v50 = vadd.f32 %v648_v49, %v647_v46  ;;  %v339_v51 = vpop.f32.mrf.mxu1  ;;  %v337_v52 = vadd.f32 %v336_v45, %v296_v47 }
  0xec   :  { %v299_v53 = vadd.f32 %v649_v50, %v579_v43  ;;  %v341_v54 = vpop.f32.mrf.mxu1  ;;  %758 = vtanh.f32 %v337_v52 }
  0xee   :  { %v340_v55 = vadd.f32 %v339_v51, %v299_v53 }
  0xf0   :  { %760 = vtanh.f32 %v340_v55 }
  0xf9   :  { %v759_v56 = vpop.eup %758 }
  0xfd   :  { %v761_v57 = vpop.eup %760 }
  0xfe   :  { %v345_v58 = vpack.c.bf16 %v761_v57, %v759_v56 }
 0x100   :  { %685 = vmatmul.mubr.bf16.vlgmr.msra.gmra.mxu0 %v345_v58 }
 0x1c0   :  { %v451_v2 = vpop.f32.mrf.mxu0 }
 0x1c1   :  { %v452_v3 = vadd.f32 %v610_v1, %v451_v2 }
 0x1c2   :  { %v686_v4 = vpop.f32.mrf.mxu0 }
 0x1c3   :  { %762 = vtanh.f32 %v452_v3 }
 0x1c4   :  { %v454_v5 = vpop.f32.mrf.mxu0 }
 0x1c5   :  { %v455_v6 = vadd.f32 %v610_v1, %v454_v5 }
 0x1c6   :  { %v687_v7 = vpop.f32.mrf.mxu0 }
 0x1c7   :  { %764 = vtanh.f32 %v455_v6 }
 0x1d0   :  { %v763_v8 = vpop.eup %762 }
 0x1d4   :  { %v765_v9 = vpop.eup %764 }
 0x1d5   :  { %v460_v10 = vpack.c.bf16 %v765_v9, %v763_v8 }
 0x1d7   :  { %705 = vmatmul.mubr.bf16.vlgmr.msra.gmra.mxu1 %v460_v10 }
 0x297   :  { %v566_v12 = vpop.f32.mrf.mxu1 }
 0x298   :  { %v567_v13 = vadd.f32 %v619_v11, %v566_v12 }
 0x299   :  { %v706_v14 = vpop.f32.mrf.mxu1 }
 0x29a   :  { %573 = vst [vmem:[%s993_s7] sm:$0xff] %v567_v13 }
 0x29b   :  { %v569_v15 = vpop.f32.mrf.mxu1 }
 0x29c   :  { %v570_v16 = vadd.f32 %v619_v11, %v569_v15 }
 0x29d   :  { %v707_v17 = vpop.f32.mrf.mxu1 }
 0x29e   :  { %574 = vst [vmem:[%s993_s7 + $0x8] sm:$0xff] %v570_v16 }

</bundles_post_ra>
